<compile_context>
chip_gen: v6e
topology: v6e:2x2x1
jax: 0.10.0
libtpu: 0.0.40
codegen_flags: <defaults>
</compile_context>

<pallas_src>
import functools

import jax
import jax.numpy as jnp
import numpy as np
from jax.experimental import pallas as pl
from jax.experimental.pallas import tpu as pltpu

POINT_DIM = 3
VOXEL_DIM = 256
NUM_HEADS = 8
HEAD_DIM = VOXEL_DIM // NUM_HEADS  # 32


def _attention_fusion_kernel(
    points_ref,            # (1, TILE_N, P)  f32
    voxel_ref,             # (1, M, D)       bf16
    wpt_ref,               # (P, 2D) f32  [ (Wp@Wq)*s | Wp@Wf_pf ]
    bpt_ref,               # (1, 2D) f32  [ (bp@Wq+bq)*s | bp@Wf_pf+bf ]
    wk_ref, bk_ref,        # (D, D) bf16, (1, D) f32
    wv_ref, bv_ref,        # (D, D) bf16, (1, D) f32
    wfa_ref,               # (D, D) bf16  (attended half of fusion weight)
    out_ref,               # (1, TILE_N, D) f32
    kT_scratch,            # (D, M) bf16   persistent per batch (K transposed)
    v_scratch,             # (M, D) bf16   persistent per batch
    att_scratch,           # (TILE_N, D) bf16
    *,
    bf16_exp,
):
    nt = pl.program_id(1)

    # K^T / V depend only on the batch index: compute once per batch element and
    # keep resident in VMEM scratch across all N tiles of that batch element.
    @pl.when(nt == 0)
    def _():
        vox = voxel_ref[0]                                                # (M, D) bf16
        k = jnp.dot(vox, wk_ref[...], preferred_element_type=jnp.float32) + bk_ref[...]
        v = jnp.dot(vox, wv_ref[...], preferred_element_type=jnp.float32) + bv_ref[...]
        # Single transpose per batch; every head then reads a clean sublane slice.
        kT_scratch[...] = k.astype(jnp.bfloat16).T                        # (D, M)
        v_scratch[...] = v.astype(jnp.bfloat16)                           # (M, D)

    pts = points_ref[0]                                                   # (TILE_N, P) f32
    # One fused K=3 matmul: lanes [0:256] = scaled q (+bias), lanes [256:512] =
    # fusion point-half (+folded fusion bias).  256-lane static slices are free.
    pq = jnp.dot(pts, wpt_ref[...], preferred_element_type=jnp.float32) + bpt_ref[...]
    q16 = pq[:, :VOXEL_DIM].astype(jnp.bfloat16)                          # (TILE_N, D) bf16
    pf_half = pq[:, VOXEL_DIM:]                                           # (TILE_N, D) f32

    # Per-head attention; static unroll with static 32-lane / 32-sublane slices.
    for h in range(NUM_HEADS):
        sl = slice(h * HEAD_DIM, (h + 1) * HEAD_DIM)
        qh = q16[:, sl]                                                   # (TILE_N, 32) bf16
        khT = kT_scratch[sl, :]                                           # (32, M) bf16 (sublane slice)
        vh = v_scratch[:, sl]                                             # (M, 32) bf16
        # scores = qh @ K^T  (softmax scale already folded into the q weights)
        s = jnp.dot(qh, khT, preferred_element_type=jnp.float32)          # (TILE_N, M) f32
        s_max = jnp.max(s, axis=-1, keepdims=True)
        x = s - s_max
        if bf16_exp:
            p16 = jnp.exp(x.astype(jnp.bfloat16))                         # bf16 EUP (v6e/v7x)
            l = jnp.sum(p16.astype(jnp.float32), axis=-1, keepdims=True)  # f32 row-sum
        else:
            p = jnp.exp(x)                                                # f32 EUP (v5e)
            l = jnp.sum(p, axis=-1, keepdims=True)
            p16 = p.astype(jnp.bfloat16)
        o = jnp.dot(p16, vh, preferred_element_type=jnp.float32)          # (TILE_N, 32) f32
        # Deferred softmax normalization on the small per-head output.
        att_scratch[:, sl] = (o * pl.reciprocal(l, approx=True)).astype(jnp.bfloat16)

    # fusion: attended half (single K=256 MXU matmul) + folded point half (+bias).
    fused = (
        jnp.dot(att_scratch[...], wfa_ref[...], preferred_element_type=jnp.float32)
        + pf_half
    )
    out_ref[0] = fused.astype(out_ref.dtype)


def _tpu_defaults():
    """Generation-aware tile / VMEM-limit / exp-dtype defaults."""
    kind = ""
    try:
        kind = jax.devices()[0].device_kind.lower()
    except Exception:  # pragma: no cover - defensive; default backend is TPU.
        pass
    is_v7 = ("v7" in kind) or ("7x" in kind)
    is_v5 = "v5" in kind
    # v7x: 64 MiB physical VMEM (32 MiB default scoped) -> smaller N tile and a
    # conservative explicit limit.  v5e/v6e: 128 MiB physical -> raise the small
    # default scoped limits so full-M tiles fit.
    max_tile_n = 256 if is_v7 else 512
    vmem_limit = (40 << 20) if is_v7 else (96 << 20)
    bf16_exp = not is_v5  # v5e has no bf16 EUP; keep f32 exp there.
    return max_tile_n, vmem_limit, bf16_exp


def attention_fusion(points, voxel_features, params, *, max_tile_n=None):
    B, N, P = points.shape
    _, M, D = voxel_features.shape
    assert P == POINT_DIM and D == VOXEL_DIM

    (wp, bp, wq, bq, wk, bk, wv, bv, wf, bf) = params
    scale = 1.0 / (HEAD_DIM ** 0.5)

    # --- one-time parameter folding (exact linear-map algebra, f32) ---
    wq_eff = (wp @ wq) * scale                               # (P, D)
    bq_eff = (bp @ wq + bq) * scale                          # (D,)
    wfp_eff = wp @ wf[:D]                                    # (P, D)
    bf_eff = bp @ wf[:D] + bf                                # (D,)
    # Fuse the two K=3 point matmuls into one (P, 2D) weight.
    w_pt = jnp.concatenate([wq_eff, wfp_eff], axis=1)        # (P, 2D)
    b_pt = jnp.concatenate([bq_eff, bf_eff]).reshape(1, 2 * D)

    wf_att = wf[D:].astype(jnp.bfloat16)                     # (D, D)
    wk16 = wk.astype(jnp.bfloat16)
    wv16 = wv.astype(jnp.bfloat16)
    bk2 = bk.reshape(1, D)
    bv2 = bv.reshape(1, D)
    vox16 = voxel_features.astype(jnp.bfloat16)              # halve voxel DMA bytes

    default_tile, vmem_limit, bf16_exp = _tpu_defaults()
    cap = default_tile if max_tile_n is None else max_tile_n
    tile_n = N if N <= cap else cap
    grid = (B, pl.cdiv(N, tile_n))

    full = lambda a: pl.BlockSpec(a.shape, lambda b, t: (0,) * a.ndim)

    grid_spec = pltpu.PrefetchScalarGridSpec(
        num_scalar_prefetch=0,
        grid=grid,
        in_specs=[
            pl.BlockSpec((1, tile_n, P), lambda b, t: (b, t, 0)),
            pl.BlockSpec((1, M, D), lambda b, t: (b, 0, 0)),
            full(w_pt), full(b_pt),
            full(wk16), full(bk2),
            full(wv16), full(bv2),
            full(wf_att),
        ],
        out_specs=pl.BlockSpec((1, tile_n, D), lambda b, t: (b, t, 0)),
        scratch_shapes=[
            pltpu.VMEM((D, M), jnp.bfloat16),        # K^T (persistent per batch)
            pltpu.VMEM((M, D), jnp.bfloat16),        # V   (persistent per batch)
            pltpu.VMEM((tile_n, D), jnp.bfloat16),   # attended heads (bf16)
        ],
    )

    kernel = functools.partial(_attention_fusion_kernel, bf16_exp=bf16_exp)

    return pl.pallas_call(
        kernel,
        out_shape=jax.ShapeDtypeStruct((B, N, D), jnp.float32),
        grid_spec=grid_spec,
        compiler_params=pltpu.CompilerParams(
            # batch axis parallel (megacore); N-tile axis carries K^T/V scratch.
            dimension_semantics=("parallel", "arbitrary"),
            vmem_limit_bytes=vmem_limit,
        ),
    )(points, vox16, w_pt, b_pt, wk16, bk2, wv16, bv2, wf_att)


def attention_fusion_ref(points, voxel_features, params):
    """Pure-JAX reference matching the PyTorch forward exactly (f32)."""
    (wp, bp, wq, bq, wk, bk, wv, bv, wf, bf) = params
    B, N, _ = points.shape
    M = voxel_features.shape[1]
    pf = points @ wp + bp
    q = (pf @ wq + bq).reshape(B, N, NUM_HEADS, HEAD_DIM).transpose(0, 2, 1, 3)
    k = (voxel_features @ wk + bk).reshape(B, M, NUM_HEADS, HEAD_DIM).transpose(0, 2, 1, 3)
    v = (voxel_features @ wv + bv).reshape(B, M, NUM_HEADS, HEAD_DIM).transpose(0, 2, 1, 3)
    attn = jnp.einsum("bhnd,bhmd->bhnm", q, k) / (HEAD_DIM ** 0.5)
    attn = jax.nn.softmax(attn, axis=-1)
    att = jnp.einsum("bhnm,bhmd->bhnd", attn, v).transpose(0, 2, 1, 3).reshape(B, N, VOXEL_DIM)
    return jnp.concatenate([pf, att], axis=-1) @ wf + bf


def init_params(key):
    """Deterministic parameter init (weights stored as (in, out))."""
    ks = jax.random.split(key, 10)

    def lin(kw, kb, fan_in, fan_out):
        lim = 1.0 / np.sqrt(fan_in)
        w = jax.random.uniform(kw, (fan_in, fan_out), jnp.float32, -lim, lim)
        b = jax.random.uniform(kb, (fan_out,), jnp.float32, -lim, lim)
        return w, b

    wp, bp = lin(ks[0], ks[1], POINT_DIM, VOXEL_DIM)
    wq, bq = lin(ks[2], ks[3], VOXEL_DIM, VOXEL_DIM)
    wk, bk = lin(ks[4], ks[5], VOXEL_DIM, VOXEL_DIM)
    wv, bv = lin(ks[6], ks[7], VOXEL_DIM, VOXEL_DIM)
    wf, bf = lin(ks[8], ks[9], 2 * VOXEL_DIM, VOXEL_DIM)
    return (wp, bp, wq, bq, wk, bk, wv, bv, wf, bf)


if __name__ == "__main__":
    key = jax.random.PRNGKey(0)
    k_pts, k_vox, k_par = jax.random.split(key, 3)

    B, N, M = 2, 8, 16
    points = jax.random.normal(k_pts, (B, N, POINT_DIM), jnp.float32)
    voxel_features = jax.random.normal(k_vox, (B, M, VOXEL_DIM), jnp.float32)
    params = init_params(k_par)

    out = jax.block_until_ready(attention_fusion(points, voxel_features, params))
    ref = jax.block_until_ready(attention_fusion_ref(points, voxel_features, params))
    np.testing.assert_allclose(np.asarray(out), np.asarray(ref), rtol=2e-2, atol=2e-2)

    print("KERNEL_OK")
</pallas_src>

<mosaic_0001>
module attributes {stable_mosaic.version = 11 : i64} {
  func.func @_attention_fusion_kernel(%arg0: i32, %arg1: i32, %arg2: memref<1x8x3xf32, #tpu.memory_space<vmem>>, %arg3: memref<1x16x256xbf16, #tpu.memory_space<vmem>>, %arg4: memref<3x512xf32, #tpu.memory_space<vmem>>, %arg5: memref<1x512xf32, #tpu.memory_space<vmem>>, %arg6: memref<256x256xbf16, #tpu.memory_space<vmem>>, %arg7: memref<1x256xf32, #tpu.memory_space<vmem>>, %arg8: memref<256x256xbf16, #tpu.memory_space<vmem>>, %arg9: memref<1x256xf32, #tpu.memory_space<vmem>>, %arg10: memref<256x256xbf16, #tpu.memory_space<vmem>>, %arg11: memref<1x8x256xf32, #tpu.memory_space<vmem>>, %arg12: memref<256x16xbf16, #tpu.memory_space<vmem>>, %arg13: memref<16x256xbf16, #tpu.memory_space<vmem>>, %arg14: memref<8x256xbf16, #tpu.memory_space<vmem>>) attributes {dimension_semantics = [#tpu.dimension_semantics<parallel>, #tpu.dimension_semantics<arbitrary>], iteration_bounds = array<i64: 2, 1>, scalar_prefetch = 0 : i64, scratch_operands = 3 : i64, tpu.core_type = #tpu.core_type<tc>, window_params = [{transform_indices = @transform_0, window_bounds = array<i64: 1, 8, 3>}, {transform_indices = @transform_1, window_bounds = array<i64: 1, 16, 256>}, {pipeline_mode = #tpu.pipeline_mode<synchronous>, transform_indices = @transform_2, window_bounds = array<i64: 3, 512>}, {pipeline_mode = #tpu.pipeline_mode<synchronous>, transform_indices = @transform_3, window_bounds = array<i64: 1, 512>}, {pipeline_mode = #tpu.pipeline_mode<synchronous>, transform_indices = @transform_4, window_bounds = array<i64: 256, 256>}, {pipeline_mode = #tpu.pipeline_mode<synchronous>, transform_indices = @transform_5, window_bounds = array<i64: 1, 256>}, {pipeline_mode = #tpu.pipeline_mode<synchronous>, transform_indices = @transform_6, window_bounds = array<i64: 256, 256>}, {pipeline_mode = #tpu.pipeline_mode<synchronous>, transform_indices = @transform_7, window_bounds = array<i64: 1, 256>}, {pipeline_mode = #tpu.pipeline_mode<synchronous>, transform_indices = @transform_8, window_bounds = array<i64: 256, 256>}, {transform_indices = @transform_9, window_bounds = array<i64: 1, 8, 256>}]} {
    %c0_i32 = arith.constant 0 : i32
    %0 = arith.cmpi eq, %arg1, %c0_i32 : i32
    %1 = arith.extui %0 : i1 to i32
    %c0_i32_0 = arith.constant 0 : i32
    %2 = arith.cmpi ne, %1, %c0_i32_0 : i32
    scf.if %2 {
      %c0_88 = arith.constant 0 : index
      %c0_89 = arith.constant 0 : index
      %c0_90 = arith.constant 0 : index
      %172 = vector.load %arg3[%c0_88, %c0_89, %c0_90] : memref<1x16x256xbf16, #tpu.memory_space<vmem>>, vector<1x16x256xbf16>
      %173 = vector.shape_cast %172 : vector<1x16x256xbf16> to vector<16x256xbf16>
      %c0_91 = arith.constant 0 : index
      %c0_92 = arith.constant 0 : index
      %174 = vector.load %arg6[%c0_91, %c0_92] : memref<256x256xbf16, #tpu.memory_space<vmem>>, vector<256x256xbf16>
      %cst_93 = arith.constant dense<0.000000e+00> : vector<16x256xf32>
      %175 = tpu.matmul %173, %174, %cst_93 {dimension_numbers = #tpu.dot_dimension_numbers<[1], [0], [0], [1], [0, 0, 1, 1], [], []>} : vector<16x256xbf16>, vector<256x256xbf16>, vector<16x256xf32> -> vector<16x256xf32>
      %c0_94 = arith.constant 0 : index
      %c0_95 = arith.constant 0 : index
      %176 = vector.load %arg7[%c0_94, %c0_95] : memref<1x256xf32, #tpu.memory_space<vmem>>, vector<1x256xf32>
      %177 = vector.broadcast %176 : vector<1x256xf32> to vector<16x256xf32>
      %178 = arith.addf %175, %177 : vector<16x256xf32>
      %c0_96 = arith.constant 0 : index
      %c0_97 = arith.constant 0 : index
      %179 = vector.load %arg8[%c0_96, %c0_97] : memref<256x256xbf16, #tpu.memory_space<vmem>>, vector<256x256xbf16>
      %cst_98 = arith.constant dense<0.000000e+00> : vector<16x256xf32>
      %180 = tpu.matmul %173, %179, %cst_98 {dimension_numbers = #tpu.dot_dimension_numbers<[1], [0], [0], [1], [0, 0, 1, 1], [], []>} : vector<16x256xbf16>, vector<256x256xbf16>, vector<16x256xf32> -> vector<16x256xf32>
      %c0_99 = arith.constant 0 : index
      %c0_100 = arith.constant 0 : index
      %181 = vector.load %arg9[%c0_99, %c0_100] : memref<1x256xf32, #tpu.memory_space<vmem>>, vector<1x256xf32>
      %182 = vector.broadcast %181 : vector<1x256xf32> to vector<16x256xf32>
      %183 = arith.addf %180, %182 : vector<16x256xf32>
      %184 = arith.truncf %178 : vector<16x256xf32> to vector<16x256xbf16>
      %185 = tpu.transpose %184, [1, 0] : vector<16x256xbf16> -> vector<256x16xbf16>
      %c0_101 = arith.constant 0 : index
      %c0_102 = arith.constant 0 : index
      %186 = vector.load %arg12[%c0_101, %c0_102] : memref<256x16xbf16, #tpu.memory_space<vmem>>, vector<256x16xbf16>
      tpu.vector_store %arg12[%c0_101, %c0_102], %185 {strides = array<i32>} : memref<256x16xbf16, #tpu.memory_space<vmem>>, vector<256x16xbf16>,
      %187 = arith.truncf %183 : vector<16x256xf32> to vector<16x256xbf16>
      %c0_103 = arith.constant 0 : index
      %c0_104 = arith.constant 0 : index
      %188 = vector.load %arg13[%c0_103, %c0_104] : memref<16x256xbf16, #tpu.memory_space<vmem>>, vector<16x256xbf16>
      tpu.vector_store %arg13[%c0_103, %c0_104], %187 {strides = array<i32>} : memref<16x256xbf16, #tpu.memory_space<vmem>>, vector<16x256xbf16>,
    } else {
    }
    %c0 = arith.constant 0 : index
    %c0_1 = arith.constant 0 : index
    %c0_2 = arith.constant 0 : index
    %3 = vector.load %arg2[%c0, %c0_1, %c0_2] : memref<1x8x3xf32, #tpu.memory_space<vmem>>, vector<1x8x3xf32>
    %4 = vector.shape_cast %3 : vector<1x8x3xf32> to vector<8x3xf32>
    %c0_3 = arith.constant 0 : index
    %c0_4 = arith.constant 0 : index
    %5 = vector.load %arg4[%c0_3, %c0_4] : memref<3x512xf32, #tpu.memory_space<vmem>>, vector<3x512xf32>
    %cst = arith.constant dense<0.000000e+00> : vector<8x512xf32>
    %6 = tpu.matmul %4, %5, %cst {dimension_numbers = #tpu.dot_dimension_numbers<[1], [0], [0], [1], [0, 0, 1, 1], [], []>} : vector<8x3xf32>, vector<3x512xf32>, vector<8x512xf32> -> vector<8x512xf32>
    %c0_5 = arith.constant 0 : index
    %c0_6 = arith.constant 0 : index
    %7 = vector.load %arg5[%c0_5, %c0_6] : memref<1x512xf32, #tpu.memory_space<vmem>>, vector<1x512xf32>
    %8 = vector.broadcast %7 : vector<1x512xf32> to vector<8x512xf32>
    %9 = arith.addf %6, %8 : vector<8x512xf32>
    %10 = vector.extract_strided_slice %9 {offsets = [0, 0], sizes = [8, 256], strides = [1, 1]} : vector<8x512xf32> to vector<8x256xf32>
    %11 = arith.truncf %10 : vector<8x256xf32> to vector<8x256xbf16>
    %12 = vector.extract_strided_slice %9 {offsets = [0, 256], sizes = [8, 256], strides = [1, 1]} : vector<8x512xf32> to vector<8x256xf32>
    %13 = vector.extract_strided_slice %11 {offsets = [0, 0], sizes = [8, 32], strides = [1, 1]} : vector<8x256xbf16> to vector<8x32xbf16>
    %c0_7 = arith.constant 0 : index
    %c0_8 = arith.constant 0 : index
    %14 = vector.load %arg12[%c0_7, %c0_8] : memref<256x16xbf16, #tpu.memory_space<vmem>>, vector<32x16xbf16>
    %c0_9 = arith.constant 0 : index
    %c0_10 = arith.constant 0 : index
    %15 = vector.load %arg13[%c0_9, %c0_10] : memref<16x256xbf16, #tpu.memory_space<vmem>>, vector<16x32xbf16>
    %cst_11 = arith.constant dense<0.000000e+00> : vector<8x16xf32>
    %16 = tpu.matmul %13, %14, %cst_11 {dimension_numbers = #tpu.dot_dimension_numbers<[1], [0], [0], [1], [0, 0, 1, 1], [], []>} : vector<8x32xbf16>, vector<32x16xbf16>, vector<8x16xf32> -> vector<8x16xf32>
    %cst_12 = arith.constant dense<0xFF800000> : vector<8xf32>
    %17 = vector.multi_reduction <maximumf>, %16, %cst_12 [1] : vector<8x16xf32> to vector<8xf32>
    %18 = vector.shape_cast %17 : vector<8xf32> to vector<8x1xf32>
    %19 = vector.broadcast %18 : vector<8x1xf32> to vector<8x16xf32>
    %20 = arith.subf %16, %19 : vector<8x16xf32>
    %21 = arith.truncf %20 : vector<8x16xf32> to vector<8x16xbf16>
    %22 = math.exp %21 : vector<8x16xbf16>
    %23 = arith.extf %22 : vector<8x16xbf16> to vector<8x16xf32>
    %cst_13 = arith.constant dense<0.000000e+00> : vector<8xf32>
    %24 = vector.multi_reduction <add>, %23, %cst_13 [1] : vector<8x16xf32> to vector<8xf32>
    %25 = vector.shape_cast %24 : vector<8xf32> to vector<8x1xf32>
    %cst_14 = arith.constant dense<0.000000e+00> : vector<8x32xf32>
    %26 = tpu.matmul %22, %15, %cst_14 {dimension_numbers = #tpu.dot_dimension_numbers<[1], [0], [0], [1], [0, 0, 1, 1], [], []>} : vector<8x16xbf16>, vector<16x32xbf16>, vector<8x32xf32> -> vector<8x32xf32>
    %27 = tpu.reciprocal %25 {approx = true} : vector<8x1xf32> -> vector<8x1xf32>
    %28 = vector.broadcast %27 : vector<8x1xf32> to vector<8x32xf32>
    %29 = arith.mulf %26, %28 : vector<8x32xf32>
    %30 = arith.truncf %29 : vector<8x32xf32> to vector<8x32xbf16>
    %c0_15 = arith.constant 0 : index
    %c0_16 = arith.constant 0 : index
    %31 = vector.load %arg14[%c0_15, %c0_16] : memref<8x256xbf16, #tpu.memory_space<vmem>>, vector<8x32xbf16>
    tpu.vector_store %arg14[%c0_15, %c0_16], %30 {strides = array<i32>} : memref<8x256xbf16, #tpu.memory_space<vmem>>, vector<8x32xbf16>,
    %32 = vector.extract_strided_slice %11 {offsets = [0, 32], sizes = [8, 32], strides = [1, 1]} : vector<8x256xbf16> to vector<8x32xbf16>
    %c32 = arith.constant 32 : index
    %c0_17 = arith.constant 0 : index
    %33 = vector.load %arg12[%c32, %c0_17] : memref<256x16xbf16, #tpu.memory_space<vmem>>, vector<32x16xbf16>
    %c0_18 = arith.constant 0 : index
    %c32_19 = arith.constant 32 : index
    %34 = vector.load %arg13[%c0_18, %c32_19] : memref<16x256xbf16, #tpu.memory_space<vmem>>, vector<16x32xbf16>
    %cst_20 = arith.constant dense<0.000000e+00> : vector<8x16xf32>
    %35 = tpu.matmul %32, %33, %cst_20 {dimension_numbers = #tpu.dot_dimension_numbers<[1], [0], [0], [1], [0, 0, 1, 1], [], []>} : vector<8x32xbf16>, vector<32x16xbf16>, vector<8x16xf32> -> vector<8x16xf32>
    %cst_21 = arith.constant dense<0xFF800000> : vector<8xf32>
    %36 = vector.multi_reduction <maximumf>, %35, %cst_21 [1] : vector<8x16xf32> to vector<8xf32>
    %37 = vector.shape_cast %36 : vector<8xf32> to vector<8x1xf32>
    %38 = vector.broadcast %37 : vector<8x1xf32> to vector<8x16xf32>
    %39 = arith.subf %35, %38 : vector<8x16xf32>
    %40 = arith.truncf %39 : vector<8x16xf32> to vector<8x16xbf16>
    %41 = math.exp %40 : vector<8x16xbf16>
    %42 = arith.extf %41 : vector<8x16xbf16> to vector<8x16xf32>
    %cst_22 = arith.constant dense<0.000000e+00> : vector<8xf32>
    %43 = vector.multi_reduction <add>, %42, %cst_22 [1] : vector<8x16xf32> to vector<8xf32>
    %44 = vector.shape_cast %43 : vector<8xf32> to vector<8x1xf32>
    %cst_23 = arith.constant dense<0.000000e+00> : vector<8x32xf32>
    %45 = tpu.matmul %41, %34, %cst_23 {dimension_numbers = #tpu.dot_dimension_numbers<[1], [0], [0], [1], [0, 0, 1, 1], [], []>} : vector<8x16xbf16>, vector<16x32xbf16>, vector<8x32xf32> -> vector<8x32xf32>
    %46 = tpu.reciprocal %44 {approx = true} : vector<8x1xf32> -> vector<8x1xf32>
    %47 = vector.broadcast %46 : vector<8x1xf32> to vector<8x32xf32>
    %48 = arith.mulf %45, %47 : vector<8x32xf32>
    %49 = arith.truncf %48 : vector<8x32xf32> to vector<8x32xbf16>
    %c0_24 = arith.constant 0 : index
    %c32_25 = arith.constant 32 : index
    %50 = vector.load %arg14[%c0_24, %c32_25] : memref<8x256xbf16, #tpu.memory_space<vmem>>, vector<8x32xbf16>
    tpu.vector_store %arg14[%c0_24, %c32_25], %49 {strides = array<i32>} : memref<8x256xbf16, #tpu.memory_space<vmem>>, vector<8x32xbf16>,
    %51 = vector.extract_strided_slice %11 {offsets = [0, 64], sizes = [8, 32], strides = [1, 1]} : vector<8x256xbf16> to vector<8x32xbf16>
    %c64 = arith.constant 64 : index
    %c0_26 = arith.constant 0 : index
    %52 = vector.load %arg12[%c64, %c0_26] : memref<256x16xbf16, #tpu.memory_space<vmem>>, vector<32x16xbf16>
    %c0_27 = arith.constant 0 : index
    %c64_28 = arith.constant 64 : index
    %53 = vector.load %arg13[%c0_27, %c64_28] : memref<16x256xbf16, #tpu.memory_space<vmem>>, vector<16x32xbf16>
    %cst_29 = arith.constant dense<0.000000e+00> : vector<8x16xf32>
    %54 = tpu.matmul %51, %52, %cst_29 {dimension_numbers = #tpu.dot_dimension_numbers<[1], [0], [0], [1], [0, 0, 1, 1], [], []>} : vector<8x32xbf16>, vector<32x16xbf16>, vector<8x16xf32> -> vector<8x16xf32>
    %cst_30 = arith.constant dense<0xFF800000> : vector<8xf32>
    %55 = vector.multi_reduction <maximumf>, %54, %cst_30 [1] : vector<8x16xf32> to vector<8xf32>
    %56 = vector.shape_cast %55 : vector<8xf32> to vector<8x1xf32>
    %57 = vector.broadcast %56 : vector<8x1xf32> to vector<8x16xf32>
    %58 = arith.subf %54, %57 : vector<8x16xf32>
    %59 = arith.truncf %58 : vector<8x16xf32> to vector<8x16xbf16>
    %60 = math.exp %59 : vector<8x16xbf16>
    %61 = arith.extf %60 : vector<8x16xbf16> to vector<8x16xf32>
    %cst_31 = arith.constant dense<0.000000e+00> : vector<8xf32>
    %62 = vector.multi_reduction <add>, %61, %cst_31 [1] : vector<8x16xf32> to vector<8xf32>
    %63 = vector.shape_cast %62 : vector<8xf32> to vector<8x1xf32>
    %cst_32 = arith.constant dense<0.000000e+00> : vector<8x32xf32>
    %64 = tpu.matmul %60, %53, %cst_32 {dimension_numbers = #tpu.dot_dimension_numbers<[1], [0], [0], [1], [0, 0, 1, 1], [], []>} : vector<8x16xbf16>, vector<16x32xbf16>, vector<8x32xf32> -> vector<8x32xf32>
    %65 = tpu.reciprocal %63 {approx = true} : vector<8x1xf32> -> vector<8x1xf32>
    %66 = vector.broadcast %65 : vector<8x1xf32> to vector<8x32xf32>
    %67 = arith.mulf %64, %66 : vector<8x32xf32>
    %68 = arith.truncf %67 : vector<8x32xf32> to vector<8x32xbf16>
    %c0_33 = arith.constant 0 : index
    %c64_34 = arith.constant 64 : index
    %69 = vector.load %arg14[%c0_33, %c64_34] : memref<8x256xbf16, #tpu.memory_space<vmem>>, vector<8x32xbf16>
    tpu.vector_store %arg14[%c0_33, %c64_34], %68 {strides = array<i32>} : memref<8x256xbf16, #tpu.memory_space<vmem>>, vector<8x32xbf16>,
    %70 = vector.extract_strided_slice %11 {offsets = [0, 96], sizes = [8, 32], strides = [1, 1]} : vector<8x256xbf16> to vector<8x32xbf16>
    %c96 = arith.constant 96 : index
    %c0_35 = arith.constant 0 : index
    %71 = vector.load %arg12[%c96, %c0_35] : memref<256x16xbf16, #tpu.memory_space<vmem>>, vector<32x16xbf16>
    %c0_36 = arith.constant 0 : index
    %c96_37 = arith.constant 96 : index
    %72 = vector.load %arg13[%c0_36, %c96_37] : memref<16x256xbf16, #tpu.memory_space<vmem>>, vector<16x32xbf16>
    %cst_38 = arith.constant dense<0.000000e+00> : vector<8x16xf32>
    %73 = tpu.matmul %70, %71, %cst_38 {dimension_numbers = #tpu.dot_dimension_numbers<[1], [0], [0], [1], [0, 0, 1, 1], [], []>} : vector<8x32xbf16>, vector<32x16xbf16>, vector<8x16xf32> -> vector<8x16xf32>
    %cst_39 = arith.constant dense<0xFF800000> : vector<8xf32>
    %74 = vector.multi_reduction <maximumf>, %73, %cst_39 [1] : vector<8x16xf32> to vector<8xf32>
    %75 = vector.shape_cast %74 : vector<8xf32> to vector<8x1xf32>
    %76 = vector.broadcast %75 : vector<8x1xf32> to vector<8x16xf32>
    %77 = arith.subf %73, %76 : vector<8x16xf32>
    %78 = arith.truncf %77 : vector<8x16xf32> to vector<8x16xbf16>
    %79 = math.exp %78 : vector<8x16xbf16>
    %80 = arith.extf %79 : vector<8x16xbf16> to vector<8x16xf32>
    %cst_40 = arith.constant dense<0.000000e+00> : vector<8xf32>
    %81 = vector.multi_reduction <add>, %80, %cst_40 [1] : vector<8x16xf32> to vector<8xf32>
    %82 = vector.shape_cast %81 : vector<8xf32> to vector<8x1xf32>
    %cst_41 = arith.constant dense<0.000000e+00> : vector<8x32xf32>
    %83 = tpu.matmul %79, %72, %cst_41 {dimension_numbers = #tpu.dot_dimension_numbers<[1], [0], [0], [1], [0, 0, 1, 1], [], []>} : vector<8x16xbf16>, vector<16x32xbf16>, vector<8x32xf32> -> vector<8x32xf32>
    %84 = tpu.reciprocal %82 {approx = true} : vector<8x1xf32> -> vector<8x1xf32>
    %85 = vector.broadcast %84 : vector<8x1xf32> to vector<8x32xf32>
    %86 = arith.mulf %83, %85 : vector<8x32xf32>
    %87 = arith.truncf %86 : vector<8x32xf32> to vector<8x32xbf16>
    %c0_42 = arith.constant 0 : index
    %c96_43 = arith.constant 96 : index
    %88 = vector.load %arg14[%c0_42, %c96_43] : memref<8x256xbf16, #tpu.memory_space<vmem>>, vector<8x32xbf16>
    tpu.vector_store %arg14[%c0_42, %c96_43], %87 {strides = array<i32>} : memref<8x256xbf16, #tpu.memory_space<vmem>>, vector<8x32xbf16>,
    %89 = vector.extract_strided_slice %11 {offsets = [0, 128], sizes = [8, 32], strides = [1, 1]} : vector<8x256xbf16> to vector<8x32xbf16>
    %c128 = arith.constant 128 : index
    %c0_44 = arith.constant 0 : index
    %90 = vector.load %arg12[%c128, %c0_44] : memref<256x16xbf16, #tpu.memory_space<vmem>>, vector<32x16xbf16>
    %c0_45 = arith.constant 0 : index
    %c128_46 = arith.constant 128 : index
    %91 = vector.load %arg13[%c0_45, %c128_46] : memref<16x256xbf16, #tpu.memory_space<vmem>>, vector<16x32xbf16>
    %cst_47 = arith.constant dense<0.000000e+00> : vector<8x16xf32>
    %92 = tpu.matmul %89, %90, %cst_47 {dimension_numbers = #tpu.dot_dimension_numbers<[1], [0], [0], [1], [0, 0, 1, 1], [], []>} : vector<8x32xbf16>, vector<32x16xbf16>, vector<8x16xf32> -> vector<8x16xf32>
    %cst_48 = arith.constant dense<0xFF800000> : vector<8xf32>
    %93 = vector.multi_reduction <maximumf>, %92, %cst_48 [1] : vector<8x16xf32> to vector<8xf32>
    %94 = vector.shape_cast %93 : vector<8xf32> to vector<8x1xf32>
    %95 = vector.broadcast %94 : vector<8x1xf32> to vector<8x16xf32>
    %96 = arith.subf %92, %95 : vector<8x16xf32>
    %97 = arith.truncf %96 : vector<8x16xf32> to vector<8x16xbf16>
    %98 = math.exp %97 : vector<8x16xbf16>
    %99 = arith.extf %98 : vector<8x16xbf16> to vector<8x16xf32>
    %cst_49 = arith.constant dense<0.000000e+00> : vector<8xf32>
    %100 = vector.multi_reduction <add>, %99, %cst_49 [1] : vector<8x16xf32> to vector<8xf32>
    %101 = vector.shape_cast %100 : vector<8xf32> to vector<8x1xf32>
    %cst_50 = arith.constant dense<0.000000e+00> : vector<8x32xf32>
    %102 = tpu.matmul %98, %91, %cst_50 {dimension_numbers = #tpu.dot_dimension_numbers<[1], [0], [0], [1], [0, 0, 1, 1], [], []>} : vector<8x16xbf16>, vector<16x32xbf16>, vector<8x32xf32> -> vector<8x32xf32>
    %103 = tpu.reciprocal %101 {approx = true} : vector<8x1xf32> -> vector<8x1xf32>
    %104 = vector.broadcast %103 : vector<8x1xf32> to vector<8x32xf32>
    %105 = arith.mulf %102, %104 : vector<8x32xf32>
    %106 = arith.truncf %105 : vector<8x32xf32> to vector<8x32xbf16>
    %c0_51 = arith.constant 0 : index
    %c128_52 = arith.constant 128 : index
    %107 = vector.load %arg14[%c0_51, %c128_52] : memref<8x256xbf16, #tpu.memory_space<vmem>>, vector<8x32xbf16>
    tpu.vector_store %arg14[%c0_51, %c128_52], %106 {strides = array<i32>} : memref<8x256xbf16, #tpu.memory_space<vmem>>, vector<8x32xbf16>,
    %108 = vector.extract_strided_slice %11 {offsets = [0, 160], sizes = [8, 32], strides = [1, 1]} : vector<8x256xbf16> to vector<8x32xbf16>
    %c160 = arith.constant 160 : index
    %c0_53 = arith.constant 0 : index
    %109 = vector.load %arg12[%c160, %c0_53] : memref<256x16xbf16, #tpu.memory_space<vmem>>, vector<32x16xbf16>
    %c0_54 = arith.constant 0 : index
    %c160_55 = arith.constant 160 : index
    %110 = vector.load %arg13[%c0_54, %c160_55] : memref<16x256xbf16, #tpu.memory_space<vmem>>, vector<16x32xbf16>
    %cst_56 = arith.constant dense<0.000000e+00> : vector<8x16xf32>
    %111 = tpu.matmul %108, %109, %cst_56 {dimension_numbers = #tpu.dot_dimension_numbers<[1], [0], [0], [1], [0, 0, 1, 1], [], []>} : vector<8x32xbf16>, vector<32x16xbf16>, vector<8x16xf32> -> vector<8x16xf32>
    %cst_57 = arith.constant dense<0xFF800000> : vector<8xf32>
    %112 = vector.multi_reduction <maximumf>, %111, %cst_57 [1] : vector<8x16xf32> to vector<8xf32>
    %113 = vector.shape_cast %112 : vector<8xf32> to vector<8x1xf32>
    %114 = vector.broadcast %113 : vector<8x1xf32> to vector<8x16xf32>
    %115 = arith.subf %111, %114 : vector<8x16xf32>
    %116 = arith.truncf %115 : vector<8x16xf32> to vector<8x16xbf16>
    %117 = math.exp %116 : vector<8x16xbf16>
    %118 = arith.extf %117 : vector<8x16xbf16> to vector<8x16xf32>
    %cst_58 = arith.constant dense<0.000000e+00> : vector<8xf32>
    %119 = vector.multi_reduction <add>, %118, %cst_58 [1] : vector<8x16xf32> to vector<8xf32>
    %120 = vector.shape_cast %119 : vector<8xf32> to vector<8x1xf32>
    %cst_59 = arith.constant dense<0.000000e+00> : vector<8x32xf32>
    %121 = tpu.matmul %117, %110, %cst_59 {dimension_numbers = #tpu.dot_dimension_numbers<[1], [0], [0], [1], [0, 0, 1, 1], [], []>} : vector<8x16xbf16>, vector<16x32xbf16>, vector<8x32xf32> -> vector<8x32xf32>
    %122 = tpu.reciprocal %120 {approx = true} : vector<8x1xf32> -> vector<8x1xf32>
    %123 = vector.broadcast %122 : vector<8x1xf32> to vector<8x32xf32>
    %124 = arith.mulf %121, %123 : vector<8x32xf32>
    %125 = arith.truncf %124 : vector<8x32xf32> to vector<8x32xbf16>
    %c0_60 = arith.constant 0 : index
    %c160_61 = arith.constant 160 : index
    %126 = vector.load %arg14[%c0_60, %c160_61] : memref<8x256xbf16, #tpu.memory_space<vmem>>, vector<8x32xbf16>
    tpu.vector_store %arg14[%c0_60, %c160_61], %125 {strides = array<i32>} : memref<8x256xbf16, #tpu.memory_space<vmem>>, vector<8x32xbf16>,
    %127 = vector.extract_strided_slice %11 {offsets = [0, 192], sizes = [8, 32], strides = [1, 1]} : vector<8x256xbf16> to vector<8x32xbf16>
    %c192 = arith.constant 192 : index
    %c0_62 = arith.constant 0 : index
    %128 = vector.load %arg12[%c192, %c0_62] : memref<256x16xbf16, #tpu.memory_space<vmem>>, vector<32x16xbf16>
    %c0_63 = arith.constant 0 : index
    %c192_64 = arith.constant 192 : index
    %129 = vector.load %arg13[%c0_63, %c192_64] : memref<16x256xbf16, #tpu.memory_space<vmem>>, vector<16x32xbf16>
    %cst_65 = arith.constant dense<0.000000e+00> : vector<8x16xf32>
    %130 = tpu.matmul %127, %128, %cst_65 {dimension_numbers = #tpu.dot_dimension_numbers<[1], [0], [0], [1], [0, 0, 1, 1], [], []>} : vector<8x32xbf16>, vector<32x16xbf16>, vector<8x16xf32> -> vector<8x16xf32>
    %cst_66 = arith.constant dense<0xFF800000> : vector<8xf32>
    %131 = vector.multi_reduction <maximumf>, %130, %cst_66 [1] : vector<8x16xf32> to vector<8xf32>
    %132 = vector.shape_cast %131 : vector<8xf32> to vector<8x1xf32>
    %133 = vector.broadcast %132 : vector<8x1xf32> to vector<8x16xf32>
    %134 = arith.subf %130, %133 : vector<8x16xf32>
    %135 = arith.truncf %134 : vector<8x16xf32> to vector<8x16xbf16>
    %136 = math.exp %135 : vector<8x16xbf16>
    %137 = arith.extf %136 : vector<8x16xbf16> to vector<8x16xf32>
    %cst_67 = arith.constant dense<0.000000e+00> : vector<8xf32>
    %138 = vector.multi_reduction <add>, %137, %cst_67 [1] : vector<8x16xf32> to vector<8xf32>
    %139 = vector.shape_cast %138 : vector<8xf32> to vector<8x1xf32>
    %cst_68 = arith.constant dense<0.000000e+00> : vector<8x32xf32>
    %140 = tpu.matmul %136, %129, %cst_68 {dimension_numbers = #tpu.dot_dimension_numbers<[1], [0], [0], [1], [0, 0, 1, 1], [], []>} : vector<8x16xbf16>, vector<16x32xbf16>, vector<8x32xf32> -> vector<8x32xf32>
    %141 = tpu.reciprocal %139 {approx = true} : vector<8x1xf32> -> vector<8x1xf32>
    %142 = vector.broadcast %141 : vector<8x1xf32> to vector<8x32xf32>
    %143 = arith.mulf %140, %142 : vector<8x32xf32>
    %144 = arith.truncf %143 : vector<8x32xf32> to vector<8x32xbf16>
    %c0_69 = arith.constant 0 : index
    %c192_70 = arith.constant 192 : index
    %145 = vector.load %arg14[%c0_69, %c192_70] : memref<8x256xbf16, #tpu.memory_space<vmem>>, vector<8x32xbf16>
    tpu.vector_store %arg14[%c0_69, %c192_70], %144 {strides = array<i32>} : memref<8x256xbf16, #tpu.memory_space<vmem>>, vector<8x32xbf16>,
    %146 = vector.extract_strided_slice %11 {offsets = [0, 224], sizes = [8, 32], strides = [1, 1]} : vector<8x256xbf16> to vector<8x32xbf16>
    %c224 = arith.constant 224 : index
    %c0_71 = arith.constant 0 : index
    %147 = vector.load %arg12[%c224, %c0_71] : memref<256x16xbf16, #tpu.memory_space<vmem>>, vector<32x16xbf16>
    %c0_72 = arith.constant 0 : index
    %c224_73 = arith.constant 224 : index
    %148 = vector.load %arg13[%c0_72, %c224_73] : memref<16x256xbf16, #tpu.memory_space<vmem>>, vector<16x32xbf16>
    %cst_74 = arith.constant dense<0.000000e+00> : vector<8x16xf32>
    %149 = tpu.matmul %146, %147, %cst_74 {dimension_numbers = #tpu.dot_dimension_numbers<[1], [0], [0], [1], [0, 0, 1, 1], [], []>} : vector<8x32xbf16>, vector<32x16xbf16>, vector<8x16xf32> -> vector<8x16xf32>
    %cst_75 = arith.constant dense<0xFF800000> : vector<8xf32>
    %150 = vector.multi_reduction <maximumf>, %149, %cst_75 [1] : vector<8x16xf32> to vector<8xf32>
    %151 = vector.shape_cast %150 : vector<8xf32> to vector<8x1xf32>
    %152 = vector.broadcast %151 : vector<8x1xf32> to vector<8x16xf32>
    %153 = arith.subf %149, %152 : vector<8x16xf32>
    %154 = arith.truncf %153 : vector<8x16xf32> to vector<8x16xbf16>
    %155 = math.exp %154 : vector<8x16xbf16>
    %156 = arith.extf %155 : vector<8x16xbf16> to vector<8x16xf32>
    %cst_76 = arith.constant dense<0.000000e+00> : vector<8xf32>
    %157 = vector.multi_reduction <add>, %156, %cst_76 [1] : vector<8x16xf32> to vector<8xf32>
    %158 = vector.shape_cast %157 : vector<8xf32> to vector<8x1xf32>
    %cst_77 = arith.constant dense<0.000000e+00> : vector<8x32xf32>
    %159 = tpu.matmul %155, %148, %cst_77 {dimension_numbers = #tpu.dot_dimension_numbers<[1], [0], [0], [1], [0, 0, 1, 1], [], []>} : vector<8x16xbf16>, vector<16x32xbf16>, vector<8x32xf32> -> vector<8x32xf32>
    %160 = tpu.reciprocal %158 {approx = true} : vector<8x1xf32> -> vector<8x1xf32>
    %161 = vector.broadcast %160 : vector<8x1xf32> to vector<8x32xf32>
    %162 = arith.mulf %159, %161 : vector<8x32xf32>
    %163 = arith.truncf %162 : vector<8x32xf32> to vector<8x32xbf16>
    %c0_78 = arith.constant 0 : index
    %c224_79 = arith.constant 224 : index
    %164 = vector.load %arg14[%c0_78, %c224_79] : memref<8x256xbf16, #tpu.memory_space<vmem>>, vector<8x32xbf16>
    tpu.vector_store %arg14[%c0_78, %c224_79], %163 {strides = array<i32>} : memref<8x256xbf16, #tpu.memory_space<vmem>>, vector<8x32xbf16>,
    %c0_80 = arith.constant 0 : index
    %c0_81 = arith.constant 0 : index
    %165 = vector.load %arg14[%c0_80, %c0_81] : memref<8x256xbf16, #tpu.memory_space<vmem>>, vector<8x256xbf16>
    %c0_82 = arith.constant 0 : index
    %c0_83 = arith.constant 0 : index
    %166 = vector.load %arg10[%c0_82, %c0_83] : memref<256x256xbf16, #tpu.memory_space<vmem>>, vector<256x256xbf16>
    %cst_84 = arith.constant dense<0.000000e+00> : vector<8x256xf32>
    %167 = tpu.matmul %165, %166, %cst_84 {dimension_numbers = #tpu.dot_dimension_numbers<[1], [0], [0], [1], [0, 0, 1, 1], [], []>} : vector<8x256xbf16>, vector<256x256xbf16>, vector<8x256xf32> -> vector<8x256xf32>
    %168 = arith.addf %167, %12 : vector<8x256xf32>
    %c0_85 = arith.constant 0 : index
    %c0_86 = arith.constant 0 : index
    %c0_87 = arith.constant 0 : index
    %169 = vector.load %arg11[%c0_85, %c0_86, %c0_87] : memref<1x8x256xf32, #tpu.memory_space<vmem>>, vector<1x8x256xf32>
    %170 = vector.shape_cast %169 : vector<1x8x256xf32> to vector<8x256xf32>
    %171 = vector.shape_cast %168 : vector<8x256xf32> to vector<1x8x256xf32>
    tpu.vector_store %arg11[%c0_85, %c0_86, %c0_87], %171 {strides = array<i32>} : memref<1x8x256xf32, #tpu.memory_space<vmem>>, vector<1x8x256xf32>,
    return
  }
  func.func @transform_0(%arg0: i32, %arg1: i32) -> (i32, i32, i32) {
    %c0_i32 = arith.constant 0 : i32
    %c0_i32_0 = arith.constant 0 : i32
    return %arg0, %arg1, %c0_i32 : i32, i32, i32
  }
  func.func @transform_1(%arg0: i32, %arg1: i32) -> (i32, i32, i32) {
    %c0_i32 = arith.constant 0 : i32
    %c0_i32_0 = arith.constant 0 : i32
    %c0_i32_1 = arith.constant 0 : i32
    return %arg0, %c0_i32, %c0_i32_0 : i32, i32, i32
  }
  func.func @transform_2(%arg0: i32, %arg1: i32) -> (i32, i32) {
    %c0_i32 = arith.constant 0 : i32
    %c0_i32_0 = arith.constant 0 : i32
    %c0_i32_1 = arith.constant 0 : i32
    return %c0_i32, %c0_i32_0 : i32, i32
  }
  func.func @transform_3(%arg0: i32, %arg1: i32) -> (i32, i32) {
    %c0_i32 = arith.constant 0 : i32
    %c0_i32_0 = arith.constant 0 : i32
    %c0_i32_1 = arith.constant 0 : i32
    return %c0_i32, %c0_i32_0 : i32, i32
  }
  func.func @transform_4(%arg0: i32, %arg1: i32) -> (i32, i32) {
    %c0_i32 = arith.constant 0 : i32
    %c0_i32_0 = arith.constant 0 : i32
    %c0_i32_1 = arith.constant 0 : i32
    return %c0_i32, %c0_i32_0 : i32, i32
  }
  func.func @transform_5(%arg0: i32, %arg1: i32) -> (i32, i32) {
    %c0_i32 = arith.constant 0 : i32
    %c0_i32_0 = arith.constant 0 : i32
    %c0_i32_1 = arith.constant 0 : i32
    return %c0_i32, %c0_i32_0 : i32, i32
  }
  func.func @transform_6(%arg0: i32, %arg1: i32) -> (i32, i32) {
    %c0_i32 = arith.constant 0 : i32
    %c0_i32_0 = arith.constant 0 : i32
    %c0_i32_1 = arith.constant 0 : i32
    return %c0_i32, %c0_i32_0 : i32, i32
  }
  func.func @transform_7(%arg0: i32, %arg1: i32) -> (i32, i32) {
    %c0_i32 = arith.constant 0 : i32
    %c0_i32_0 = arith.constant 0 : i32
    %c0_i32_1 = arith.constant 0 : i32
    return %c0_i32, %c0_i32_0 : i32, i32
  }
  func.func @transform_8(%arg0: i32, %arg1: i32) -> (i32, i32) {
    %c0_i32 = arith.constant 0 : i32
    %c0_i32_0 = arith.constant 0 : i32
    %c0_i32_1 = arith.constant 0 : i32
    return %c0_i32, %c0_i32_0 : i32, i32
  }
  func.func @transform_9(%arg0: i32, %arg1: i32) -> (i32, i32, i32) {
    %c0_i32 = arith.constant 0 : i32
    %c0_i32_0 = arith.constant 0 : i32
    return %arg0, %arg1, %c0_i32 : i32, i32, i32
  }
}

</mosaic_0001>

<bundles_post_ra>
// kernel: tpu_custom_call.1
= control target key start
LH: loop header
LB: loop body
LE: loop exit
PB: predicated region body
PF: predicated region fallthrough
CT: control target
= control target key end

     0   :  { %s4188_s0 = inlined_call_operand.vmem [shape: f32[2,8,3], index: 0, kind: input, shape index: {}]   ;;  %s4189_s1 = inlined_call_operand.hbm [shape: bf16[2,16,256], index: 1, kind: input, shape index: {}]   ;;  %s4190_s2 = inlined_call_operand.vmem [shape: f32[3,512], index: 2, kind: input, shape index: {}]   ;;  %s4191_s3 = inlined_call_operand.vmem [shape: f32[1,512], index: 3, kind: input, shape index: {}]   ;;  %s4192_s4 = inlined_call_operand.hbm [shape: bf16[256,256], index: 4, kind: input, shape index: {}]   ;;  %s4193_s5 = inlined_call_operand.vmem [shape: f32[1,256], index: 5, kind: input, shape index: {}]   ;;  %s4194_s6 = inlined_call_operand.hbm [shape: bf16[256,256], index: 6, kind: input, shape index: {}]   ;;  %s4195_s7 = inlined_call_operand.vmem [shape: f32[1,256], index: 7, kind: input, shape index: {}]   ;;  %s4196_s8 = inlined_call_operand.hbm [shape: bf16[256,256], index: 8, kind: input, shape index: {}]   ;;  %s4197_s9 = inlined_call_operand.hbm [shape: f32[2,8,256], index: 9, kind: output, shape index: {}]  }
   0x1   :  { %4203 = sst [smem:[#allocation20_spill]] %s4192_s4 }
   0x2   :  { %4204 = sst [smem:[#allocation21_spill]] %s4194_s6 }
   0x3   :  { %4205 = sst [smem:[#allocation22_spill]] %s4196_s8 }
   0x4   :  { %14 = vsyncpa [#allocation6], 0 }
   0x5   :  { %16 = vsyncpa [#allocation6 + $0x1], 0 }
   0x6   :  { %17 = vsyncpa [#allocation9], 0 }
   0x7   :  { %18 = vsyncpa [#allocation12], 0 }
   0x8   :  { %19 = vsyncpa [#allocation7], 0 }
   0x9   :  { %21 = vsyncpa [#allocation7 + $0x1], 0  ;;  %s3723_s30 = smov 0   ;;  %s3725_s10 = smov 0  }
   0xa   :  { %s3727_s11 = smov 0   ;;  %s3729_s12 = smov 0  }
   0xb   :  { %s3731_s13 = smov 0   ;;  %s3733_s14 = smov 0  }
   0xc LB: > { %s2788_s15 = sadd.s32 4294967295, %s3659_s14   ;;  %s2789_s16 = sadd.s32 4294967294, %s3659_s14   ;;  %s3659_s14 = sphi %s3733_s14, %s27_s14   ;;  %s3655_s13 = sphi %s3731_s13, %s4230_s13   ;;  %s3651_s12 = sphi %s3729_s12, %s4229_s12   ;;  %s3647_s11 = sphi %s3727_s11, %s4228_s11   ;;  %s3643_s10 = sphi %s3725_s10, %s4227_s10   ;;  %s3639_s30 = sphi %s3723_s30, %s4226_s30  }
   0xd   : > { %p87_p0 = scmp.ne.s32.totalorder %s3643_s10, %s3639_s30  ;;  %p3757_p1 = scmp.eq.s32.totalorder %s2788_s15, 0 }
   0xe   : > { %p3761_p2 = scmp.eq.s32.totalorder %s2788_s15, 1  ;;  %p266_p3 = scmp.eq.s32.totalorder %s2789_s16, 1 }
   0xf   : > { %p3767_p4 = por %p3757_p1, %p87_p0  ;;  %p2790_p5 = scmp.ge.s32.totalorder %s3659_s14, 1 }
  0x10   : > { %p3772_p6 = por %p266_p3, %p87_p0  ;;  %p273_p7 = scmp.lt.s32.totalorder %s3659_s14, 3 }
  0x11   : > { %s3661_s22 = smov [#allocation8]   ;;  %s3662_s25 = smov [#allocation10]  }
  0x12   : > { %s4209_s20 = scalar_select %p3772_p6, 1, 0 }
  0x13   : > { %p3777_p8 = pnand %p2790_p5, %p273_p7  ;;  %s291_s23 = sshll.u32 %s3661_s22, 4  ;;  %s292_s23 = int_to_ptr.vmem [resolvable:$true] %s291_s23 }
  0x14   : > { %4210 = sst [smem:[#allocation18_spill]] %s4209_s20  ;;  %s307_s26 = sshll.u32 %s3662_s25, 4  ;;  %s308_s26 = int_to_ptr.vmem [resolvable:$true] %s307_s26 }
  0x15   : > { %p3174_p9 = pneg %p3777_p8  ;;  %s3663_s27 = smov [#allocation11]  }
  0x16   : > { %s323_s28 = sshll.u32 %s3663_s27, 4  ;;  %s3476_s29 = scalar_lea.vmem %s292_s23, 4096  ;;  %s324_s28 = int_to_ptr.vmem [resolvable:$true] %s323_s28 }
  0x17   : > { %p3786_p11 = pnand %p3174_p9, %p3757_p1  ;;  %p3477_p13 = scmp.ne.s32.totalorder %s292_s23, %s3476_s29 }
  0x18   : > { %p3484_p5 = scmp.lt.s32.totalorder %s292_s23, %s292_s23  ;;  %p3485_p7 = scmp.lt.s32.totalorder %s3476_s29, %s3476_s29 }
  0x19   : > { %p3467_p12 = pneg %p3786_p11 }
  0x1a   : > { %p3486_p9 = por %p3485_p7, %p3484_p5 }
  0x1b   : > { %p3479_p0 = pnand %p3477_p13, %p3467_p12 }
  0x1d   : > { %p3480_p3 = pneg %p3479_p0 }
  0x1f   : > { %p3487_p10 = pnand %p3486_p9, %p3480_p3 }
  0x21   : > { %3490 = shalt.err (!%p3487_p10)
}
  0x22   : > { %s4199_s15 = smov 128   ;;  %s4200_s16 = smov 8  }
  0x23   : > { %s4213_s4 = sld [smem:[#allocation20_spill]]  ;;  %s3502_s27 = scalar_lea.vmem %s308_s26, 4096 }
  0x24   : > { %p3503_p13 = scmp.ne.s32.totalorder %s308_s26, %s3502_s27  ;;  %p3510_p3 = scmp.lt.s32.totalorder %s308_s26, %s308_s26 }
  0x25   : > { %p3511_p10 = scmp.lt.s32.totalorder %s3502_s27, %s3502_s27 }
  0x26   : > { %p3505_p0 = pnand %p3503_p13, %p3467_p12 }
  0x27   : > { %p3512_p7 = por %p3511_p10, %p3510_p3 }
  0x28   : > { %p3506_p5 = pneg %p3505_p0 }
  0x29   : > { %3177 = dma.hbm_to_vmem [thread:$0]  (!%p3786_p11), %s4213_s4, 4096, %s292_s23, [#allocation9], %s4199_s15, %s4199_s15, %s4200_s16  }
  0x2a   : > { %p3513_p9 = pnand %p3512_p7, %p3506_p5 }
  0x2c   : > { %3516 = shalt.err (!%p3513_p9)
}
  0x2d   : > { %s4214_s6 = sld [smem:[#allocation21_spill]]  ;;  %s3528_s23 = scalar_lea.vmem %s324_s28, 4096 }
  0x2e   : > { %p3529_p6 = scmp.ne.s32.totalorder %s324_s28, %s3528_s23  ;;  %p3536_p3 = scmp.lt.s32.totalorder %s324_s28, %s324_s28 }
  0x2f   : > { %p3537_p5 = scmp.lt.s32.totalorder %s3528_s23, %s3528_s23 }
  0x30   : > { %p3531_p13 = pnand %p3529_p6, %p3467_p12 }
  0x31   : > { %p3538_p10 = por %p3537_p5, %p3536_p3 }
  0x32   : > { %p3532_p0 = pneg %p3531_p13 }
  0x33   : > { %3180 = dma.hbm_to_vmem [thread:$0]  (!%p3786_p11), %s4214_s6, 4096, %s308_s26, [#allocation9], %s4199_s15, %s4199_s15, %s4200_s16  }
  0x34   : > { %p3539_p7 = pnand %p3538_p10, %p3532_p0 }
  0x36   : > { %3542 = shalt.err (!%p3539_p7)
}
  0x37   : > { %s4215_s8 = sld [smem:[#allocation22_spill]]  ;;  %s74_s26 = sadd.s32 1, %s3647_s11 }
  0x38   : > { %s39_s24 = sadd.s32 1, %s3655_s13  ;;  %p81_p6 = scmp.ne.s32.totalorder %s3647_s11, %s3643_s10 }
  0x39   : > { %p41_p12 = scmp.ge.s32.totalorder %s39_s24, 2  ;;  %p82_p9 = scmp.eq.s32.totalorder %s3659_s14, 0 }
  0x3a   : > { %p3832_p13 = por %p3761_p2, %p81_p6  ;;  %p3195_p0 = scmp.lt.s32.totalorder %s3659_s14, 2 }
  0x3b   : > { %s4232_s24 = smov (%p41_p12, %s39_s24), 0  ;;  %p83_p3 = por %p82_p9, %p81_p6 }
  0x3c   : > { %s4216_s25 = scalar_select %p3832_p13, 1, 0 }
  0x3d   : > { %3183 = dma.hbm_to_vmem [thread:$0]  (!%p3786_p11), %s4215_s8, 4096, %s324_s28, [#allocation12], %s4199_s15, %s4199_s15, %s4200_s16  }
  0x3e   : > { %4217 = sst [smem:[#allocation19_spill]] %s4232_s24  ;;  %s347_s27 = sand.u32 1, %s3647_s11  }
  0x3f   : > { %s71_s29 = ssub.s32 %s3655_s13, %s4232_s24  ;;  %s2795_s28 = sshll.u32 %s347_s27, 4 }
  0x40   : > { %p72_p5 = scmp.eq.s32.totalorder %s71_s29, 0  ;;  %s2996_s23 = sshll.u32 %s3655_s13, 8 }
  0x41   : > { %s357_s18 = scalar_lea.hbm %s4189_s1, %s2996_s23  ;;  %s351_s16 = scalar_lea.vmem [#allocation5], %s2795_s28 }
  0x42   : > { %s3844_s20 = scalar_select %p72_p5, %s3647_s11, %s74_s26  }
  0x43   : > { %s358_s4 = sshll.u32 %s351_s16, 4  ;;  %p3851_p2 = pnand %p3195_p0, %p83_p3  ;;  %s359_s4 = int_to_ptr.vmem [resolvable:$true] %s358_s4 }
  0x44   : > { %s348_s8 = scalar_lea.sflag [#allocation6], %s347_s27  ;;  %s3556_s29 = scalar_lea.vmem %s359_s4, 256 }
  0x45   : > { %p3545_p11 = pneg %p3851_p2  ;;  %p3557_p10 = scmp.ne.s32.totalorder %s359_s4, %s3556_s29 }
  0x46   : > { %s3666_s26 = smov [#allocation5]  }
  0x47   : > { %p3559_p7 = pnand %p3557_p10, %p3545_p11  ;;  %s3561_s24 = sshll.u32 %s3666_s26, 4  ;;  %s3562_s24 = int_to_ptr.vmem [resolvable:$false] %s3561_s24 }
  0x48   : > { %s3563_s15 = scalar_lea.vmem %s3562_s24, 512  ;;  %p3564_p12 = scmp.lt.s32.totalorder %s359_s4, %s3562_s24 }
  0x49   : > { %p3560_p6 = pneg %p3559_p7  ;;  %p3565_p9 = scmp.lt.s32.totalorder %s3563_s15, %s3556_s29 }
  0x4b   : > { %p3566_p5 = por %p3565_p9, %p3564_p12 }
  0x4d   : > { %p3567_p13 = pnand %p3566_p5, %p3560_p6 }
  0x4f   : > { %3570 = shalt.err (!%p3567_p13)
}
  0x50   : > { %s4219_s16 = smov 8   ;;  %s4220_s28 = smov 128  }
  0x51   : > { %3187 = dma.hbm_to_vmem [thread:$0]  (!%p3851_p2), %s357_s18, 256, %s359_s4, %s348_s8, %s4220_s28, %s4220_s28, %s4219_s16  }
  0x52   : > { %370 = sbr.rel (%p3777_p8) target bundleno = 2176 (0x880), region = 56  ;;  %s3865_s27 = sand.u32 (!%p3777_p8), 1, %s3643_s10  }
  0x53   : > { %s2799_s24 = sshll.u32 (!%p3777_p8), %s3865_s27, 4  ;;  %s373_s23 = scalar_lea.sflag (!%p3777_p8), [#allocation6], %s3865_s27 }
  0x54   : > { %s3871_s22 = scalar_lea.vmem (!%p3777_p8), [#allocation5], %s2799_s24 }
  0x57   : > { %3622 = dma.done.wait (%p3767_p4), %s373_s23, 256  }
  0x58   : > { %3624 = vsyncadd (%p3767_p4), %s373_s23, 4294967040 }
  0x59   : > { %3626 = dma.done.wait (%p3757_p1), [#allocation9], 8192  }
  0x5a   : > { %3628 = vsyncadd (%p3757_p1), [#allocation9], 4294959104 }
  0x5b   : > { %3630 = dma.done.wait (%p3757_p1), [#allocation12], 4096  }
  0x5c   : > { %3632 = vsyncadd (%p3757_p1), [#allocation12], 4294963200  ;;  %v3259_v0 = vld [vmem:[#allocation8 + $0x74] ss:$8 sps:$4 sm:$0xff]   ;;  %v3261_v1 = vld [vmem:[#allocation8 + $0x70] ss:$8 sps:$4 sm:$0xff]   ;;  %v478_v57 = vlaneseq }
  0x5d   : > { %658 = vmatprep.subr.bf16.mxu0 %v3259_v0  ;;  %v3262_v2 = vld [vmem:[#allocation8 + $0x64] ss:$8 sps:$4 sm:$0xff]   ;;  %v3264_v3 = vld [vmem:[#allocation8 + $0x60] ss:$8 sps:$4 sm:$0xff]   ;;  %v3265_v4 = vld [vmem:[#allocation8 + $0x54] ss:$8 sps:$4 sm:$0xff]  }
  0x5e   : > { %659 = vmatpush1.bf16.msra.mxu0 %v3261_v1  ;;  %v3267_v5 = vld [vmem:[#allocation8 + $0x50] ss:$8 sps:$4 sm:$0xff]   ;;  %v3268_v6 = vld [vmem:[#allocation8 + $0x44] ss:$8 sps:$4 sm:$0xff]   ;;  %v3270_v7 = vld [vmem:[#allocation8 + $0x40] ss:$8 sps:$4 sm:$0xff]  }
  0x5f   : > { %660 = vmatprep.subr.bf16.mxu0 %v3262_v2  ;;  %v3271_v8 = vld [vmem:[#allocation8 + $0x34] ss:$8 sps:$4 sm:$0xff]   ;;  %v3273_v9 = vld [vmem:[#allocation8 + $0x30] ss:$8 sps:$4 sm:$0xff]   ;;  %v3274_v10 = vld [vmem:[#allocation8 + $0x24] ss:$8 sps:$4 sm:$0xff]  }
  0x60   : > { %v3276_v11 = vld [vmem:[#allocation8 + $0x20] ss:$8 sps:$4 sm:$0xff]   ;;  %v3277_v12 = vld [vmem:[#allocation8 + $0x14] ss:$8 sps:$4 sm:$0xff]   ;;  %v3279_v14 = vld [vmem:[#allocation8 + $0x10] ss:$8 sps:$4 sm:$0xff]  }
  0x61   : > { %v3309_v13 = vld [vmem:[%s3871_s22 + $0x4] ss:$8 sps:$4 sm:$0xff]   ;;  %v3282_v16 = vld [vmem:[#allocation8] ss:$8 sps:$4 sm:$0xff]   ;;  %v3285_v18 = vld [vmem:[#allocation8 + $0xf0] ss:$8 sps:$4 sm:$0xff]  }
  0x62   : > { %661 = vmatpush1.bf16.msra.mxu0 %v3264_v3  ;;  %v3280_v15 = vld [vmem:[#allocation8 + $0x4] ss:$8 sps:$4 sm:$0xff]   ;;  %690 = vmatprep.mubr.bf16.mxu0 %v3309_v13  ;;  %v3283_v17 = vld [vmem:[#allocation8 + $0xf4] ss:$8 sps:$4 sm:$0xff]   ;;  %v3288_v20 = vld [vmem:[#allocation8 + $0xe0] ss:$8 sps:$4 sm:$0xff]  }
  0x63   : > { %662 = vmatprep.subr.bf16.mxu0 %v3265_v4  ;;  %937 = vmatprep.mubr.bf16.mxu1 %v3309_v13  ;;  %v3286_v19 = vld [vmem:[#allocation8 + $0xe4] ss:$8 sps:$4 sm:$0xff]   ;;  %v3289_v21 = vld [vmem:[#allocation8 + $0xd4] ss:$8 sps:$4 sm:$0xff]   ;;  %v3291_v22 = vld [vmem:[#allocation8 + $0xd0] ss:$8 sps:$4 sm:$0xff]  }
  0x64   : > { %v3292_v23 = vld [vmem:[#allocation8 + $0xc4] ss:$8 sps:$4 sm:$0xff]   ;;  %v3294_v24 = vld [vmem:[#allocation8 + $0xc0] ss:$8 sps:$4 sm:$0xff]   ;;  %v3295_v25 = vld [vmem:[#allocation8 + $0xb4] ss:$8 sps:$4 sm:$0xff]  }
  0x65   : > { %v3297_v26 = vld [vmem:[#allocation8 + $0xb0] ss:$8 sps:$4 sm:$0xff]   ;;  %v3298_v27 = vld [vmem:[#allocation8 + $0xa4] ss:$8 sps:$4 sm:$0xff]   ;;  %v3300_v28 = vld [vmem:[#allocation8 + $0xa0] ss:$8 sps:$4 sm:$0xff]  }
  0x66   : > { %663 = vmatpush1.bf16.msra.mxu0 %v3267_v5  ;;  %v3301_v29 = vld [vmem:[#allocation8 + $0x94] ss:$8 sps:$4 sm:$0xff]   ;;  %v3303_v30 = vld [vmem:[#allocation8 + $0x90] ss:$8 sps:$4 sm:$0xff]   ;;  %v3304_v31 = vld [vmem:[#allocation8 + $0x84] ss:$8 sps:$4 sm:$0xff]  }
  0x67   : > { %664 = vmatprep.subr.bf16.mxu0 %v3268_v6  ;;  %v1142_v32 = vld [vmem:[%s4190_s2] sm:$0x77]  ;;  %p430_p1 = scmp.lt.s32.totalorder %s3651_s12, 1  ;;  %vm1174_vm0 = vcmask 1042432   ;;  %v3667_v36 = vmov 0.0   ;;  %vm1170_vm1 = vcmask 23552  }
  0x68   : > { %v3306_v33 = vld [vmem:[#allocation8 + $0x80] ss:$8 sps:$4 sm:$0xff]   ;;  %v1168_v34 = vcombine.high %v1142_v32, %v1142_v32  ;;  %v3311_v38 = vld [vmem:[#allocation10 + $0x74] ss:$8 sps:$4 sm:$0xff]   ;;  %v3313_v39 = vld [vmem:[#allocation10 + $0x70] ss:$8 sps:$4 sm:$0xff]  }
  0x69   : > { %s431_s8 = scalar_select %p430_p1, %s3651_s12, 1  ;;  %v3892_v35 = vld [vmem:[%s3871_s22] ss:$8 sps:$4 sm:$0xff]   ;;  %v3314_v40 = vld [vmem:[#allocation10 + $0x64] ss:$8 sps:$4 sm:$0xff]   ;;  %905 = vmatprep.subr.bf16.mxu1 %v3311_v38  ;;  %v3910_v60 = vshrl.u32 %v478_v57, 7 }
  0x6a   : > { %665 = vmatpush1.bf16.msra.mxu0 %v3270_v7  ;;  %906 = vmatpush1.bf16.msra.mxu1 %v3313_v39  ;;  %v3316_v41 = vld [vmem:[#allocation10 + $0x60] ss:$8 sps:$4 sm:$0xff]   ;;  %v3317_v42 = vld [vmem:[#allocation10 + $0x54] ss:$8 sps:$4 sm:$0xff]   ;;  %v3319_v43 = vld [vmem:[#allocation10 + $0x50] ss:$8 sps:$4 sm:$0xff]  }
  0x6b   : > { %666 = vmatprep.subr.bf16.mxu0 %v3271_v8  ;;  %s2804_s17 = sshll.u32 %s431_s8, 3  ;;  %907 = vmatprep.subr.bf16.mxu1 %v3314_v40  ;;  %v3320_v44 = vld [vmem:[#allocation10 + $0x44] ss:$8 sps:$4 sm:$0xff]   ;;  %v707_v48 = vld [vmem:[#allocation10 + $0x30] sm:$0xff]  ;;  %v708_v49 = vld [vmem:[#allocation10 + $0x38] sm:$0xff]  ;;  %v3913_v63 = vsub.s32 0, %v3910_v60 }
  0x6c   : > { %s436_s18 = scalar_lea.vmem %s4188_s0, %s2804_s17  ;;  %v709_v45 = vld [vmem:[#allocation10 + $0x40] sm:$0xff]  ;;  %v710_v46 = vld [vmem:[#allocation10 + $0x48] sm:$0xff]  ;;  %v3322_v50 = vld [vmem:[#allocation10 + $0x34] ss:$8 sps:$4 sm:$0xff]   ;;  %v2845_v51 = vcombine.low %v707_v48, %v708_v49  ;;  %v3919_v2 = vsub.s32 1, %v3910_v60  ;;  %vm3668_vm2 = vmmov 0  }
  0x6d   : > { %v1141_v37 = vld [vmem:[%s436_s18] sm:$0xff]  ;;  %v2847_v47 = vcombine.low %v709_v45, %v710_v46  ;;  %v3327_v54 = vld [vmem:[#allocation10 + $0x14] ss:$8 sps:$4 sm:$0xff]   ;;  %v3329_v58 = vld [vmem:[#allocation10 + $0x10] ss:$8 sps:$4 sm:$0xff]   ;;  %s3669_s22 = smov 96  }
  0x6e   : > { %667 = vmatpush1.bf16.msra.mxu0 %v3273_v9  ;;  %908 = vmatpush1.bf16.msra.mxu1 %v3316_v41  ;;  %v3324_v52 = vld [vmem:[#allocation10 + $0x24] ss:$8 sps:$4 sm:$0xff]   ;;  %v3326_v53 = vld [vmem:[#allocation10 + $0x20] ss:$8 sps:$4 sm:$0xff]   ;;  %v1143_v55 = vld [vmem:[%s4190_s2 + $0x8] sm:$0x77] }
  0x6f   : > { %668 = vmatprep.subr.bf16.mxu0 %v3274_v10  ;;  %909 = vmatprep.subr.bf16.mxu1 %v3317_v42  ;;  %v1169_v56 = vcombine.high %v1143_v55, %v1143_v55  ;;  %v3331_v59 = vld [vmem:[#allocation10 + $0x4] ss:$8 sps:$4 sm:$0xff]   ;;  %v3333_v61 = vld [vmem:[#allocation10] ss:$8 sps:$4 sm:$0xff]   ;;  %v3335_v62 = vld [vmem:[#allocation10 + $0xf4] ss:$8 sps:$4 sm:$0xff]  }
  0x70   : > { %v3337_v0 = vld [vmem:[#allocation10 + $0xf0] ss:$8 sps:$4 sm:$0xff]   ;;  %v476_v1 = vld [vmem:[%s4193_s5] sm:$0x3]  ;;  %v3339_v3 = vld [vmem:[#allocation10 + $0xe4] ss:$8 sps:$4 sm:$0xff]  }
  0x71   : > { %v481_v5 = vrot.slane %v476_v1, %v3913_v63  ;;  %v3341_v7 = vld [vmem:[#allocation10 + $0xe0] ss:$8 sps:$4 sm:$0xff]   ;;  %v3342_v8 = vld [vmem:[#allocation10 + $0xd4] ss:$8 sps:$4 sm:$0xff]   ;;  %v485_v9 = vrot.slane %v476_v1, %v3919_v2  ;;  %v3344_v13 = vld [vmem:[#allocation10 + $0xd0] ss:$8 sps:$4 sm:$0xff]  }
  0x72   : > { %669 = vmatpush1.bf16.msra.mxu0 %v3276_v11  ;;  %910 = vmatpush1.bf16.msra.mxu1 %v3319_v43  ;;  %vm1094_vm3 = vcmask 125952   ;;  %vm1345_vm4 = vcmask 261120   ;;  %vm1389_vm5 = vcmask 130048   ;;  %s3670_s8 = smov 32   ;;  %s3671_s17 = smov 64   ;;  %vm1454_vm6 = vcmask 257024  }
  0x73   : > { %670 = vmatprep.subr.bf16.mxu0 %v3277_v12  ;;  %911 = vmatprep.subr.bf16.mxu1 %v3320_v44  ;;  %vm1592_vm7 = vcmask 519424   ;;  %vm1729_vm8 = vcmask 781824   ;;  %vm1866_vm9 = vcmask 1044224   ;;  %s3005_s18 = sshll.u32 %s3651_s12, 8  ;;  %s429_s29 = scalar_lea.vmem [#allocation13], %s2799_s24 }
  0x74   : > { %s2663_s26 = sshll.u32 %s429_s29, 4  ;;  %s4140_s28 = scalar_lea.hbm %s4197_s9, %s3005_s18  ;;  %s4142_s26 = int_to_ptr.vmem [resolvable:$true] %s2663_s26 }
  0x75   : > { %s2647_s12 = scalar_lea.sflag [#allocation7], %s3865_s27  ;;  %s3571_s24 = scalar_lea.vmem %s4142_s26, 256 }
  0x76   : > { %671 = vmatpush1.bf16.msra.mxu0 %v3279_v14  ;;  %912 = vmatpush1.bf16.msra.mxu1 %v2847_v47  ;;  %p3572_p4 = scmp.ne.s32.totalorder %s4142_s26, %s3571_s24  ;;  %p4221_p8 = scmp.ne.s32.totalorder %s4216_s25, 0 }
  0x77   : > { %672 = vmatprep.subr.bf16.mxu0 %v3280_v15  ;;  %913 = vmatprep.subr.bf16.mxu1 %v3322_v50  ;;  %v3345_v15 = vld [vmem:[#allocation10 + $0xc4] ss:$8 sps:$4 sm:$0xff]   ;;  %s3672_s23 = smov [#allocation13]  }
  0x78   : > { %p3573_p13 = pnand %p3572_p4, %p4221_p8 }
  0x7a   : > { %673 = vmatpush1.bf16.msra.mxu0 %v3282_v16  ;;  %914 = vmatpush1.bf16.msra.mxu1 %v2845_v51  ;;  %p3574_p0 = pneg %p3573_p13 }
  0x7b   : > { %674 = vmatprep.subr.bf16.mxu0 %v3283_v17  ;;  %915 = vmatprep.subr.bf16.mxu1 %v3324_v52 }
  0x7e   : > { %675 = vmatpush2.bf16.msra.mxu0 %v3285_v18  ;;  %916 = vmatpush1.bf16.msra.mxu1 %v3326_v53 }
  0x7f   : > { %676 = vmatprep.subr.bf16.mxu0 %v3286_v19  ;;  %917 = vmatprep.subr.bf16.mxu1 %v3327_v54  ;;  %v3347_v19 = vld [vmem:[#allocation10 + $0xc0] ss:$8 sps:$4 sm:$0xff]  }
  0x82   : > { %677 = vmatpush2.bf16.msra.mxu0 %v3288_v20  ;;  %918 = vmatpush1.bf16.msra.mxu1 %v3329_v58 }
  0x83   : > { %678 = vmatprep.subr.bf16.mxu0 %v3289_v21  ;;  %919 = vmatprep.subr.bf16.mxu1 %v3331_v59  ;;  %v3348_v21 = vld [vmem:[#allocation10 + $0xb4] ss:$8 sps:$4 sm:$0xff]  }
  0x86   : > { %679 = vmatpush2.bf16.msra.mxu0 %v3291_v22  ;;  %920 = vmatpush1.bf16.msra.mxu1 %v3333_v61  ;;  %v3350_v22 = vld [vmem:[#allocation10 + $0xb0] ss:$8 sps:$4 sm:$0xff]  }
  0x87   : > { %680 = vmatprep.subr.bf16.mxu0 %v3292_v23  ;;  %921 = vmatprep.subr.bf16.mxu1 %v3335_v62  ;;  %v3352_v23 = vld [vmem:[#allocation10 + $0xa4] ss:$8 sps:$4 sm:$0xff]  }
  0x8a   : > { %681 = vmatpush2.bf16.msra.mxu0 %v3294_v24  ;;  %922 = vmatpush2.bf16.msra.mxu1 %v3337_v0  ;;  %v3354_v24 = vld [vmem:[#allocation10 + $0xa0] ss:$8 sps:$4 sm:$0xff]  }
  0x8b   : > { %682 = vmatprep.subr.bf16.mxu0 %v3295_v25  ;;  %923 = vmatprep.subr.bf16.mxu1 %v3339_v3  ;;  %v3356_v25 = vld [vmem:[#allocation10 + $0x94] ss:$8 sps:$4 sm:$0xff]   ;;  %v733_v3 = vld [vmem:[%s4195_s7] sm:$0x3] }
  0x8e   : > { %683 = vmatpush2.bf16.msra.mxu0 %v3297_v26  ;;  %924 = vmatpush2.bf16.msra.mxu1 %v3341_v7  ;;  %v3358_v26 = vld [vmem:[#allocation10 + $0x90] ss:$8 sps:$4 sm:$0xff]  }
  0x8f   : > { %684 = vmatprep.subr.bf16.mxu0 %v3298_v27  ;;  %925 = vmatprep.subr.bf16.mxu1 %v3342_v8  ;;  %v3359_v27 = vld [vmem:[#allocation10 + $0x84] ss:$8 sps:$4 sm:$0xff]  }
  0x92   : > { %685 = vmatpush2.bf16.msra.mxu0 %v3300_v28  ;;  %926 = vmatpush2.bf16.msra.mxu1 %v3344_v13  ;;  %v3361_v28 = vld [vmem:[#allocation10 + $0x80] ss:$8 sps:$4 sm:$0xff]  }
  0x93   : > { %686 = vmatprep.subr.bf16.mxu0 %v3301_v29  ;;  %927 = vmatprep.subr.bf16.mxu1 %v3345_v15  ;;  %v3935_v29 = vld [vmem:[%s4191_s3] sm:$0xf] }
  0x96   : > { %687 = vmatpush2.bf16.msra.mxu0 %v3303_v30  ;;  %928 = vmatpush2.bf16.msra.mxu1 %v3347_v19  ;;  %v1149_v30 = vrot.slane %v3935_v29, %v3913_v63 }
  0x97   : > { %688 = vmatprep.subr.bf16.mxu0 %v3304_v31  ;;  %929 = vmatprep.subr.bf16.mxu1 %v3348_v21 }
  0x9a   : > { %689 = vmatpush2.bf16.msra.mxu0 %v3306_v33  ;;  %930 = vmatpush2.bf16.msra.mxu1 %v3350_v22 }
  0x9b   : > { %2905 = vmatprep.subr.msk.mxu0 %vm1174_vm0, %v1168_v34  ;;  %931 = vmatprep.subr.bf16.mxu1 %v3352_v23 }
  0x9d   : > { %691 = vmatmul.mubr.bf16.vlgmr.msra.gmra.mxu0 %v3892_v35 }
  0x9e   : > { %2906 = vmatpush1.msk.msra.mxu0 %vm1174_vm0, %v1142_v32  ;;  %1247 = vmatprep.mubr.f32.mxu0 %v3667_v36 }
  0x9f   : > { %2908 = vmatprep.subr.msk.mxu0 %vm1174_vm0, %v1169_v56  ;;  %932 = vmatpush2.bf16.msra.mxu1 %v3354_v24 }
  0xa0   : > { %933 = vmatprep.subr.bf16.mxu1 %v3356_v25 }
  0xa3   : > { %934 = vmatpush2.bf16.msra.mxu1 %v3358_v26 }
  0xa4   : > { %935 = vmatprep.subr.bf16.mxu1 %v3359_v27  ;;  %v1153_v27 = vrot.slane %v3935_v29, %v3919_v2 }
  0xa5   : > { %2907 = vmatmul.mubr.msk.f32.vlgmr.msra.gmra.mxu0 %vm1170_vm1, %v1141_v37 }
  0xa6   : > { %1318 = vmatprep.mubr.f32.mxu0 %v3667_v36  ;;  %2909 = vmatpush1.msk.msra.mxu0 %vm1174_vm0, %v1143_v55 }
  0xa7   : > { %3046 = vmatprep.subr.bf16.mxu0 %v3667_v36  ;;  %936 = vmatpush2.bf16.msra.mxu1 %v3361_v28 }
  0xa8   : > { %3054 = vmatprep.subr.bf16.mxu1 %v3667_v36 }
  0xa9   : > { %2910 = vmatmul.mubr.msk.f32.vlgmr.msra.gmra.mxu0 %vm1170_vm1, %v1141_v37 }
  0xaa   : > { %3050 = vmatprep.mubr.msk.bf16.mxu0 %vm3668_vm2, %v3667_v36  ;;  %938 = vmatmul.mubr.bf16.vlgmr.msra.gmra.mxu1 %v3892_v35 }
  0xab   : > { %3056 = vmatprep.mubr.msk.bf16.mxu1 %vm3668_vm2, %v3667_v36 }
 0x15d   : > { %v692_v4 = vpop.f32.mrf.mxu0 }
 0x15e   : > { %v693_v11 = vadd.f32 %v692_v4, %v481_v5  ;;  %v738_v4 = vrot.slane %v733_v3, %v3913_v63 }
 0x15f   : > { %v694_v6 = vpop.f32.mrf.mxu0 }
 0x160   : > { %v3925_v16 = vadd.f32 %v694_v6, %v485_v9 }
 0x161   : > { %v696_v10 = vpop.f32.mrf.mxu0 }
 0x162   : > { %v697_v12 = vadd.f32 %v696_v10, %v481_v5  ;;  %v742_v5 = vrot.slane %v733_v3, %v3919_v2 }
 0x163   : > { %v698_v14 = vpop.f32.mrf.mxu0 }
 0x164   : > { %v3927_v17 = vadd.f32 %v698_v14, %v485_v9  ;;  %v948_v18 = vpack.c.bf16 %v697_v12, %v693_v11 }
 0x165   : > { %v1249_v31 = vpop.f32.mrf.mxu0 }
 0x166   : > { %950 = vxpose.xlu0.c.b16.start.end [1/1] (short) %v948_v18, 128  ;;  %v949_v20 = vpack.c.bf16 %v3927_v17, %v3925_v16  ;;  %v1250_v32 = vadd.f32 %v1249_v31, %v1149_v30 }
 0x167   : > { %v1251_v19 = vpop.f32.mrf.mxu0 }
 0x168   : > { %v3942_v33 = vpack.c.bf16 %v1250_v32, %v1250_v32  ;;  %v1252_v28 = vadd.f32 %v1251_v19, %v1153_v27 }
 0x169   : > { %v3979_v63 = vpop.f32.mrf.mxu0 }
 0x16a   : > { %v939_v6 = vpop.f32.mrf.mxu1  ;;  %v3988_v30 = vpack.c.bf16 %v1252_v28, %v1252_v28 }
 0x16b   : > { %v940_v7 = vadd.f32 %v939_v6, %v738_v4  ;;  %v3981_v21 = vpop.f32.mrf.mxu0 }
 0x16c   : > { %v941_v8 = vpop.f32.mrf.mxu1 }
 0x16d   : > { %v942_v9 = vadd.f32 %v941_v8, %v742_v5 }
 0x16e   : > { %v943_v10 = vpop.f32.mrf.mxu1 }
 0x16f   : > { %v2997_v11 = vpack.c.bf16 %v942_v9, %v940_v7  ;;  %v944_v12 = vadd.f32 %v943_v10, %v738_v4 }
 0x170   : > { %v945_v13 = vpop.f32.mrf.mxu1 }
 0x171   : > { %1139 = vst [vmem:[#allocation3] sm:$0xff] %v2997_v11  ;;  %v946_v14 = vadd.f32 %v945_v13, %v742_v5 }
 0x173   : > { %v2998_v15 = vpack.c.bf16 %v946_v14, %v944_v12 }
 0x175   : > { %1140 = vst [vmem:[#allocation3 + $0x8] sm:$0xff] %v2998_v15 }
 0x17c   : > { %v3363_v18 = vld [vmem:[#allocation3] ss:$8 sps:$4 sm:$0xff]  }
 0x17d   : > { %3055 = vmatpush3.bf16.msra.mxu1 %v3363_v18 }
 0x17e   : > { %3102 = vmatprep.subr.bf16.mxu1 %v3667_v36 }
 0x18b   : > { %1463 = vrot.lane.b32.xlu0 %v3942_v33, %s3669_s22 }
 0x1c8   : > { %v958_v34 = vpop.trf.xlu0 }
 0x1c9   : > { %v2871_v37 = vcombine.low %v958_v34, %v958_v34  ;;  %v2872_v38 = vcombine.high %v958_v34, %v958_v34 }
 0x1cb   : > { %1095 = vst.msk [vmem:[#allocation2] sm:$0xf] %vm1094_vm3, %v2871_v37  ;;  %1096 = vst.msk [vmem:[#allocation2 + $0x4] sm:$0xf] %vm1094_vm3, %v2872_v38  ;;  %v3362_v37 = vld [vmem:[#allocation3] ss:$8 sps:$4 sm:$0xff]  }
 0x1cc   : > { %v959_v35 = vpop.trf.xlu0 }
 0x1cd   : > { %v2873_v39 = vcombine.low %v959_v35, %v959_v35  ;;  %v2874_v40 = vcombine.high %v959_v35, %v959_v35 }
 0x1cf   : > { %1097 = vst.msk [vmem:[#allocation2 + $0x8] sm:$0xf] %vm1094_vm3, %v2873_v39  ;;  %1098 = vst.msk [vmem:[#allocation2 + $0xc] sm:$0xf] %vm1094_vm3, %v2874_v40 }
 0x1d0   : > { %v960_v41 = vpop.trf.xlu0 }
 0x1d1   : > { %v2875_v42 = vcombine.low %v960_v41, %v960_v41  ;;  %v2876_v43 = vcombine.high %v960_v41, %v960_v41 }
 0x1d2   : > { %v3338_v48 = vld [vmem:[#allocation2] sm:$0xff]  }
 0x1d3   : > { %1099 = vst.msk [vmem:[#allocation2 + $0x10] sm:$0xf] %vm1094_vm3, %v2875_v42  ;;  %1100 = vst.msk [vmem:[#allocation2 + $0x14] sm:$0xf] %vm1094_vm3, %v2876_v43 }
 0x1d4   : > { %v961_v44 = vpop.trf.xlu0 }
 0x1d5   : > { %v2877_v45 = vcombine.low %v961_v44, %v961_v44  ;;  %v2878_v46 = vcombine.high %v961_v44, %v961_v44 }
 0x1d6   : > { %v3334_v47 = vld [vmem:[#allocation2 + $0x8] sm:$0xff]  }
 0x1d7   : > { %1101 = vst.msk [vmem:[#allocation2 + $0x18] sm:$0xf] %vm1094_vm3, %v2877_v45  ;;  %1102 = vst.msk [vmem:[#allocation2 + $0x1c] sm:$0xf] %vm1094_vm3, %v2878_v46  ;;  %3047 = vmatpush3.bf16.msra.mxu0 %v3334_v47 }
 0x1d8   : > { %v962_v49 = vpop.trf.xlu0  ;;  %3048 = vmatprep.subr.bf16.mxu0 %v3667_v36 }
 0x1d9   : > { %v2879_v50 = vcombine.low %v962_v49, %v962_v49  ;;  %v2880_v51 = vcombine.high %v962_v49, %v962_v49 }
 0x1da   : > { %v3355_v56 = vld [vmem:[#allocation2 + $0x10] sm:$0xff]  }
 0x1db   : > { %1103 = vst.msk [vmem:[#allocation2 + $0x20] sm:$0xf] %vm1094_vm3, %v2879_v50  ;;  %1104 = vst.msk [vmem:[#allocation2 + $0x24] sm:$0xf] %vm1094_vm3, %v2880_v51  ;;  %3049 = vmatpush3.bf16.msra.mxu0 %v3338_v48 }
 0x1dc   : > { %v963_v52 = vpop.trf.xlu0  ;;  %3060 = vmatprep.subr.bf16.mxu0 %v3667_v36 }
 0x1dd   : > { %v2881_v53 = vcombine.low %v963_v52, %v963_v52  ;;  %v2882_v54 = vcombine.high %v963_v52, %v963_v52 }
 0x1de   : > { %v3351_v55 = vld [vmem:[#allocation2 + $0x18] sm:$0xff]   ;;  %3051 = vmatmul.mubr.msk.bf16.vlgmr.msra.gmra.mxu0 %vm1345_vm4, %v3942_v33 }
 0x1df   : > { %1105 = vst.msk [vmem:[#allocation2 + $0x28] sm:$0xf] %vm1094_vm3, %v2881_v53  ;;  %1106 = vst.msk [vmem:[#allocation2 + $0x2c] sm:$0xf] %vm1094_vm3, %v2882_v54  ;;  %3061 = vmatpush3.bf16.msra.mxu0 %v3351_v55  ;;  %3064 = vmatprep.mubr.msk.bf16.mxu0 %vm3668_vm2, %v3667_v36 }
 0x1e0   : > { %v964_v57 = vpop.trf.xlu0  ;;  %3062 = vmatprep.subr.bf16.mxu0 %v3667_v36 }
 0x1e1   : > { %v2883_v58 = vcombine.low %v964_v57, %v964_v57  ;;  %v2884_v59 = vcombine.high %v964_v57, %v964_v57 }
 0x1e2   : > { %v3365_v48 = vld [vmem:[#allocation2 + $0x20] sm:$0xff]  }
 0x1e3   : > { %1107 = vst.msk [vmem:[#allocation2 + $0x30] sm:$0xf] %vm1094_vm3, %v2883_v58  ;;  %1108 = vst.msk [vmem:[#allocation2 + $0x34] sm:$0xf] %vm1094_vm3, %v2884_v59  ;;  %3063 = vmatpush3.bf16.msra.mxu0 %v3355_v56 }
 0x1e4   : > { %v965_v61 = vpop.trf.xlu0  ;;  %3068 = vmatprep.subr.bf16.mxu0 %v3667_v36 }
 0x1e5   : > { %v2885_v62 = vcombine.low %v965_v61, %v965_v61  ;;  %v2886_v0 = vcombine.high %v965_v61, %v965_v61 }
 0x1e6   : > { %v3364_v47 = vld [vmem:[#allocation2 + $0x28] sm:$0xff]  }
 0x1e7   : > { %1109 = vst.msk [vmem:[#allocation2 + $0x38] sm:$0xf] %vm1094_vm3, %v2885_v62  ;;  %1110 = vst.msk [vmem:[#allocation2 + $0x3c] sm:$0xf] %vm1094_vm3, %v2886_v0 }
 0x1ea   : > { %v3368_v19 = vld [vmem:[#allocation2 + $0x30] sm:$0xff]  }
 0x1ee   : > { %v3367_v13 = vld [vmem:[#allocation2 + $0x38] sm:$0xff]  }
 0x1fd   : > { %v1464_v1 = vpop.permute.xlu0 %1463 }
 0x1fe   : > { %3065 = vmatmul.mubr.msk.bf16.vlgmr.msra.gmra.mxu0 %vm1345_vm4, %v1464_v1  ;;  %v3366_v1 = vld [vmem:[#allocation3] ss:$8 sps:$4 sm:$0xff]  }
 0x1ff   : > { %3070 = vmatprep.mubr.msk.bf16.mxu0 %vm3668_vm2, %v3667_v36 }
 0x29e   : > { %v1383_v22 = vpop.f32.mrf.mxu0 }
 0x29f   : > { %v1390_v23 = vsel %vm1389_vm5, %v1383_v22, -inf }
 0x2a0   : > { %1391 = vmax.xlane.f32.xlu0 %v1390_v23  ;;  %v3052_v24 = vpop.f32.mrf.mxu0 }
 0x2a2   : > { %v1386_v25 = vpop.f32.mrf.mxu0 }
 0x2a4   : > { %v3053_v26 = vpop.f32.mrf.mxu0 }
 0x2b6   : > { %1737 = vrot.lane.b32.xlu0 %v3942_v33, %s3670_s8 }
 0x2ba   : > { %2001 = vrot.lane.b32.xlu0 %v3988_v30, %s3669_s22 }
 0x2be   : > { %v1514_v31 = vpop.f32.mrf.mxu0  ;;  %2137 = vrot.lane.b32.xlu0 %v3988_v30, %s3671_s17 }
 0x2bf   : > { %v1520_v32 = vsel %vm1389_vm5, %v1514_v31, -inf }
 0x2c0   : > { %1521 = vmax.xlane.f32.xlu1 %v1520_v32  ;;  %v3066_v34 = vpop.f32.mrf.mxu0 }
 0x2c2   : > { %v1517_v2 = vpop.f32.mrf.mxu0  ;;  %2273 = vrot.lane.b32.xlu0 %v3988_v30, %s3670_s8 }
 0x2c4   : > { %v3067_v29 = vpop.f32.mrf.mxu0 }
 0x2d1   : > { %1537 = vrot.lane.b32.xlu1 %v3362_v37, %s3669_s22 }
 0x2d5   : > { %1600 = vrot.lane.b32.xlu1 %v3942_v33, %s3671_s17 }
 0x329   : > { %v1392_v38 = vpop.xlane.xlu0 %1391 }
 0x32a   : > { %v1393_v35 = vsub.f32 %v1383_v22, %v1392_v38 }
 0x32c   : > { %v1394_v39 = vpack.c.bf16 %v1393_v35, %v1393_v35 }
 0x32d   : > { %v1738_v25 = vpop.permute.xlu0 %1737 }
 0x32e   : > { %v1396_v40 = vmul.bf16 1069105081, %v1394_v39 }
 0x330   : > { %3432 = vpow.bf16 %v1396_v40 }
 0x33e   : > { %v4000_v41 = vpop.eup %3432 }
 0x33f   : > { %3057 = vmatmul.mubr.msk.bf16.vlgmr.msra.gmra.mxu1 %vm1389_vm5, %v4000_v41 }
 0x340   : > { %3106 = vmatprep.mubr.msk.bf16.mxu1 %vm3668_vm2, %v3667_v36 }
 0x349   : > { %v1522_v42 = vpop.xlane.xlu1 %1521 }
 0x34a   : > { %v1523_v43 = vsub.f32 %v1514_v31, %v1522_v42 }
 0x34c   : > { %v1524_v44 = vpack.c.bf16 %v1523_v43, %v1523_v43 }
 0x34d   : > { %v1538_v45 = vpop.permute.xlu1 %1537 }
 0x34e   : > { %v1526_v46 = vmul.bf16 1069105081, %v1524_v44  ;;  %3069 = vmatpush3.bf16.msra.mxu0 %v1538_v45 }
 0x34f   : > { %3074 = vmatprep.subr.bf16.mxu0 %v3667_v36 }
 0x350   : > { %3434 = vpow.bf16 %v1526_v46 }
 0x351   : > { %v1601_v49 = vpop.permute.xlu1 %1600 }
 0x35e   : > { %v4007_v33 = vpop.eup %3434 }
 0x35f   : > { %3071 = vmatmul.mubr.msk.bf16.vlgmr.msra.gmra.mxu0 %vm1389_vm5, %v4007_v33 }
 0x360   : > { %3075 = vmatpush3.bf16.msra.mxu0 %v3364_v47  ;;  %3078 = vmatprep.mubr.msk.bf16.mxu0 %vm3668_vm2, %v3667_v36 }
 0x361   : > { %3076 = vmatprep.subr.bf16.mxu0 %v3667_v36 }
 0x364   : > { %3077 = vmatpush3.bf16.msra.mxu0 %v3365_v48 }
 0x365   : > { %3082 = vmatprep.subr.bf16.mxu0 %v3667_v36 }
 0x367   : > { %3079 = vmatmul.mubr.msk.bf16.vlgmr.msra.gmra.mxu0 %vm1345_vm4, %v1601_v49 }
 0x368   : > { %3084 = vmatprep.mubr.msk.bf16.mxu0 %vm3668_vm2, %v3667_v36 }
 0x3ff   : > { %v4018_v50 = vpop.f32.mrf.mxu1 }
 0x401   : > { %v3058_v51 = vpop.f32.mrf.mxu1 }
 0x403   : > { %v1448_v52 = vpop.f32.mrf.mxu1 }
 0x405   : > { %v3059_v53 = vpop.f32.mrf.mxu1 }
 0x41f   : > { %v4020_v54 = vpop.f32.mrf.mxu0 }
 0x421   : > { %v3072_v55 = vpop.f32.mrf.mxu0 }
 0x423   : > { %v1580_v56 = vpop.f32.mrf.mxu0 }
 0x425   : > { %v3073_v57 = vpop.f32.mrf.mxu0 }
 0x427   : > { %v1651_v58 = vpop.f32.mrf.mxu0 }
 0x428   : > { %v1657_v59 = vsel %vm1389_vm5, %v1651_v58, -inf }
 0x429   : > { %1658 = vmax.xlane.f32.xlu1 %v1657_v59  ;;  %v3080_v61 = vpop.f32.mrf.mxu0 }
 0x42b   : > { %v1654_v62 = vpop.f32.mrf.mxu0 }
 0x42d   : > { %v3081_v0 = vpop.f32.mrf.mxu0 }
 0x43a   : > { %1674 = vrot.lane.b32.xlu1 %v3366_v1, %s3671_s17 }
 0x45d   : > { %966 = vxpose.xlu1.c.b16.start.end [1/1] (short) %v949_v20, 128 }
 0x4b2   : > { %v1659_v3 = vpop.xlane.xlu1 %1658 }
 0x4b3   : > { %v1660_v4 = vsub.f32 %v1651_v58, %v1659_v3 }
 0x4b5   : > { %v1661_v5 = vpack.c.bf16 %v1660_v4, %v1660_v4 }
 0x4b6   : > { %v1675_v6 = vpop.permute.xlu1 %1674 }
 0x4b7   : > { %v1663_v7 = vmul.bf16 1069105081, %v1661_v5  ;;  %3083 = vmatpush3.bf16.msra.mxu0 %v1675_v6 }
 0x4b8   : > { %3088 = vmatprep.subr.bf16.mxu0 %v3667_v36 }
 0x4b9   : > { %3436 = vpow.bf16 %v1663_v7 }
 0x4bf   : > { %v974_v8 = vpop.trf.xlu1 }
 0x4c0   : > { %v2887_v9 = vcombine.low %v974_v8, %v974_v8  ;;  %v2888_v10 = vcombine.high %v974_v8, %v974_v8 }
 0x4c2   : > { %1111 = vst.msk [vmem:[#allocation2 + $0x40] sm:$0xf] %vm1094_vm3, %v2887_v9  ;;  %1112 = vst.msk [vmem:[#allocation2 + $0x44] sm:$0xf] %vm1094_vm3, %v2888_v10 }
 0x4c3   : > { %v975_v11 = vpop.trf.xlu1 }
 0x4c4   : > { %v2889_v12 = vcombine.low %v975_v11, %v975_v11  ;;  %v2890_v16 = vcombine.high %v975_v11, %v975_v11 }
 0x4c6   : > { %1113 = vst.msk [vmem:[#allocation2 + $0x48] sm:$0xf] %vm1094_vm3, %v2889_v12  ;;  %1114 = vst.msk [vmem:[#allocation2 + $0x4c] sm:$0xf] %vm1094_vm3, %v2890_v16 }
 0x4c7   : > { %v4032_v17 = vpop.eup %3436  ;;  %v976_v20 = vpop.trf.xlu1 }
 0x4c8   : > { %v2891_v14 = vcombine.low %v976_v20, %v976_v20  ;;  %v2892_v15 = vcombine.high %v976_v20, %v976_v20  ;;  %3085 = vmatmul.mubr.msk.bf16.vlgmr.msra.gmra.mxu0 %vm1389_vm5, %v4032_v17 }
 0x4c9   : > { %3089 = vmatpush3.bf16.msra.mxu0 %v3367_v13  ;;  %3092 = vmatprep.mubr.msk.bf16.mxu0 %vm3668_vm2, %v3667_v36  ;;  %v3370_v31 = vld [vmem:[#allocation2 + $0x40] sm:$0xff]  }
 0x4ca   : > { %1115 = vst.msk [vmem:[#allocation2 + $0x50] sm:$0xf] %vm1094_vm3, %v2891_v14  ;;  %1116 = vst.msk [vmem:[#allocation2 + $0x54] sm:$0xf] %vm1094_vm3, %v2892_v15  ;;  %3090 = vmatprep.subr.bf16.mxu0 %v3667_v36 }
 0x4cb   : > { %v977_v18 = vpop.trf.xlu1 }
 0x4cc   : > { %v2893_v22 = vcombine.low %v977_v18, %v977_v18  ;;  %v2894_v23 = vcombine.high %v977_v18, %v977_v18 }
 0x4cd   : > { %3091 = vmatpush3.bf16.msra.mxu0 %v3368_v19  ;;  %v3369_v24 = vld [vmem:[#allocation2 + $0x48] sm:$0xff]  }
 0x4ce   : > { %1117 = vst.msk [vmem:[#allocation2 + $0x58] sm:$0xf] %vm1094_vm3, %v2893_v22  ;;  %1118 = vst.msk [vmem:[#allocation2 + $0x5c] sm:$0xf] %vm1094_vm3, %v2894_v23  ;;  %3096 = vmatprep.subr.bf16.mxu0 %v3667_v36  ;;  %3103 = vmatpush3.bf16.msra.mxu1 %v3369_v24  ;;  %v3377_v22 = vld [vmem:[#allocation3 + $0x4] ss:$8 sps:$4 sm:$0xff]  }
 0x4cf   : > { %v978_v26 = vpop.trf.xlu1  ;;  %3104 = vmatprep.subr.bf16.mxu1 %v3667_v36  ;;  %v3378_v23 = vld [vmem:[#allocation3] ss:$8 sps:$4 sm:$0xff]   ;;  %v3379_v24 = vld [vmem:[#allocation3 + $0x4] ss:$8 sps:$4 sm:$0xff]  }
 0x4d0   : > { %v2895_v27 = vcombine.low %v978_v26, %v978_v26  ;;  %v2896_v28 = vcombine.high %v978_v26, %v978_v26  ;;  %3093 = vmatmul.mubr.msk.bf16.vlgmr.msra.gmra.mxu0 %vm1345_vm4, %v1738_v25  ;;  %v3380_v25 = vld [vmem:[#allocation3 + $0x4] ss:$8 sps:$4 sm:$0xff]   ;;  %v1528_v26 = vunpack.c.l.bf16 %v4007_v33 }
 0x4d1   : > { %3098 = vmatprep.mubr.msk.bf16.mxu0 %vm3668_vm2, %v3667_v36  ;;  %v3372_v39 = vld [vmem:[#allocation2 + $0x50] sm:$0xff]  }
 0x4d2   : > { %1119 = vst.msk [vmem:[#allocation2 + $0x60] sm:$0xf] %vm1094_vm3, %v2895_v27  ;;  %1120 = vst.msk [vmem:[#allocation2 + $0x64] sm:$0xf] %vm1094_vm3, %v2896_v28  ;;  %3105 = vmatpush3.bf16.msra.mxu1 %v3370_v31  ;;  %v1529_v27 = vsel %vm1389_vm5, %v1528_v26, 0.0  ;;  %v1665_v28 = vunpack.c.l.bf16 %v4032_v17 }
 0x4d3   : > { %v979_v32 = vpop.trf.xlu1  ;;  %3116 = vmatprep.subr.bf16.mxu1 %v3667_v36  ;;  %v3390_v26 = vld [vmem:[#allocation11 + $0x54] ss:$8 sps:$4 sm:$0xff]  }
 0x4d4   : > { %v2897_v34 = vcombine.low %v979_v32, %v979_v32  ;;  %v2898_v2 = vcombine.high %v979_v32, %v979_v32  ;;  %v1666_v31 = vsel %vm1389_vm5, %v1665_v28, 0.0  ;;  %v3391_v28 = vld [vmem:[#allocation11 + $0x40] ss:$8 sps:$4 sm:$0xff]  }
 0x4d5   : > { %v3371_v29 = vld [vmem:[#allocation2 + $0x58] sm:$0xff]   ;;  %3107 = vmatmul.mubr.msk.bf16.vlgmr.msra.gmra.mxu1 %vm1345_vm4, %v3988_v30  ;;  %v2002_v30 = vpop.permute.xlu0 %2001 }
 0x4d6   : > { %1121 = vst.msk [vmem:[#allocation2 + $0x68] sm:$0xf] %vm1094_vm3, %v2897_v34  ;;  %1122 = vst.msk [vmem:[#allocation2 + $0x6c] sm:$0xf] %vm1094_vm3, %v2898_v2  ;;  %3117 = vmatpush3.bf16.msra.mxu1 %v3371_v29  ;;  %3120 = vmatprep.mubr.msk.bf16.mxu1 %vm3668_vm2, %v3667_v36 }
 0x4d7   : > { %v980_v37 = vpop.trf.xlu1  ;;  %3118 = vmatprep.subr.bf16.mxu1 %v3667_v36 }
 0x4d8   : > { %v2899_v38 = vcombine.low %v980_v37, %v980_v37  ;;  %v2900_v35 = vcombine.high %v980_v37, %v980_v37 }
 0x4d9   : > { %v3374_v45 = vld [vmem:[#allocation2 + $0x60] sm:$0xff]   ;;  %v2138_v46 = vpop.permute.xlu0 %2137 }
 0x4da   : > { %1123 = vst.msk [vmem:[#allocation2 + $0x70] sm:$0xf] %vm1094_vm3, %v2899_v38  ;;  %1124 = vst.msk [vmem:[#allocation2 + $0x74] sm:$0xf] %vm1094_vm3, %v2900_v35  ;;  %3119 = vmatpush3.bf16.msra.mxu1 %v3372_v39 }
 0x4db   : > { %v981_v40 = vpop.trf.xlu1  ;;  %3130 = vmatprep.subr.bf16.mxu1 %v3667_v36 }
 0x4dc   : > { %v2901_v42 = vcombine.low %v981_v40, %v981_v40  ;;  %v2902_v43 = vcombine.high %v981_v40, %v981_v40 }
 0x4dd   : > { %v3373_v44 = vld [vmem:[#allocation2 + $0x68] sm:$0xff]   ;;  %3121 = vmatmul.mubr.msk.bf16.vlgmr.msra.gmra.mxu1 %vm1345_vm4, %v2002_v30  ;;  %v2274_v49 = vpop.permute.xlu0 %2273 }
 0x4de   : > { %1125 = vst.msk [vmem:[#allocation2 + $0x78] sm:$0xf] %vm1094_vm3, %v2901_v42  ;;  %1126 = vst.msk [vmem:[#allocation2 + $0x7c] sm:$0xf] %vm1094_vm3, %v2902_v43  ;;  %3131 = vmatpush3.bf16.msra.mxu1 %v3373_v44  ;;  %3134 = vmatprep.mubr.msk.bf16.mxu1 %vm3668_vm2, %v3667_v36 }
 0x4df   : > { %3132 = vmatprep.subr.bf16.mxu1 %v3667_v36 }
 0x4e1   : > { %v3376_v48 = vld [vmem:[#allocation2 + $0x70] sm:$0xff]  }
 0x4e2   : > { %3133 = vmatpush3.bf16.msra.mxu1 %v3374_v45 }
 0x4e3   : > { %3144 = vmatprep.subr.bf16.mxu1 %v3667_v36 }
 0x4e5   : > { %v3375_v47 = vld [vmem:[#allocation2 + $0x78] sm:$0xff]   ;;  %3135 = vmatmul.mubr.msk.bf16.vlgmr.msra.gmra.mxu1 %vm1345_vm4, %v2138_v46 }
 0x4e6   : > { %3145 = vmatpush3.bf16.msra.mxu1 %v3375_v47  ;;  %3148 = vmatprep.mubr.msk.bf16.mxu1 %vm3668_vm2, %v3667_v36 }
 0x4e7   : > { %3146 = vmatprep.subr.bf16.mxu1 %v3667_v36 }
 0x4ea   : > { %3147 = vmatpush3.bf16.msra.mxu1 %v3376_v48 }
 0x4ed   : > { %3149 = vmatmul.mubr.msk.bf16.vlgmr.msra.gmra.mxu1 %vm1345_vm4, %v2274_v49 }
 0x588   : > { %v4073_v51 = vpop.f32.mrf.mxu0 }
 0x58a   : > { %v3086_v52 = vpop.f32.mrf.mxu0 }
 0x58c   : > { %v1717_v53 = vpop.f32.mrf.mxu0 }
 0x58e   : > { %v3087_v55 = vpop.f32.mrf.mxu0 }
 0x590   : > { %v1788_v56 = vpop.f32.mrf.mxu0 }
 0x591   : > { %v1794_v16 = vsel %vm1389_vm5, %v1788_v56, -inf }
 0x592   : > { %v3094_v57 = vpop.f32.mrf.mxu0 }
 0x594   : > { %v1791_v58 = vpop.f32.mrf.mxu0 }
 0x595   : > { %v1923_v61 = vpop.f32.mrf.mxu1 }
 0x596   : > { %v3095_v59 = vpop.f32.mrf.mxu0  ;;  %v1929_v62 = vsel %vm1389_vm5, %v1923_v61, -inf }
 0x597   : > { %1930 = vmax.xlane.f32.xlu1 %v1929_v62  ;;  %v3108_v0 = vpop.f32.mrf.mxu1  ;;  %v3381_v62 = vld [vmem:[#allocation3 + $0x4] ss:$8 sps:$4 sm:$0xff]  }
 0x599   : > { %v1926_v1 = vpop.f32.mrf.mxu1 }
 0x59b   : > { %v3109_v3 = vpop.f32.mrf.mxu1 }
 0x59d   : > { %v2052_v4 = vpop.f32.mrf.mxu1 }
 0x59e   : > { %v2058_v5 = vsel %vm1389_vm5, %v2052_v4, -inf }
 0x59f   : > { %2059 = vmax.xlane.f32.xlu0 %v2058_v5  ;;  %v3122_v6 = vpop.f32.mrf.mxu1 }
 0x5a1   : > { %v2055_v7 = vpop.f32.mrf.mxu1 }
 0x5a3   : > { %v3123_v8 = vpop.f32.mrf.mxu1 }
 0x5a5   : > { %v2188_v9 = vpop.f32.mrf.mxu1 }
 0x5a6   : > { %v2194_v10 = vsel %vm1389_vm5, %v2188_v9, -inf }
 0x5a7   : > { %2195 = vmax.xlane.f32.xlu0 %v2194_v10  ;;  %v3136_v11 = vpop.f32.mrf.mxu1 }
 0x5a9   : > { %v2191_v12 = vpop.f32.mrf.mxu1 }
 0x5ab   : > { %1795 = vmax.xlane.f32.xlu0 %v1794_v16  ;;  %v3137_v20 = vpop.f32.mrf.mxu1 }
 0x5ad   : > { %v2324_v13 = vpop.f32.mrf.mxu1 }
 0x5ae   : > { %v2330_v14 = vsel %vm1389_vm5, %v2324_v13, -inf }
 0x5af   : > { %2331 = vmax.xlane.f32.xlu1 %v2330_v14  ;;  %v3150_v15 = vpop.f32.mrf.mxu1 }
 0x5b1   : > { %v2327_v18 = vpop.f32.mrf.mxu1 }
 0x5b3   : > { %v3151_v19 = vpop.f32.mrf.mxu1 }
 0x5c0   : > { %2075 = vrot.lane.b32.xlu1 %v3377_v22, %s3669_s22 }
 0x5c1   : > { %1811 = vrot.lane.b32.xlu0 %v3378_v23, %s3670_s8  ;;  %v3382_v23 = vld [vmem:[#allocation11 + $0x70] ss:$8 sps:$4 sm:$0xff]  }
 0x5c5   : > { %2211 = vrot.lane.b32.xlu0 %v3379_v24, %s3671_s17  ;;  %v3387_v24 = vld [vmem:[#allocation11 + $0x64] ss:$8 sps:$4 sm:$0xff]  }
 0x5c9   : > { %2347 = vrot.lane.b32.xlu0 %v3380_v25, %s3670_s8  ;;  %v3385_v25 = vld [vmem:[#allocation11 + $0x60] ss:$8 sps:$4 sm:$0xff]  }
 0x5e8   : > { %1530 = vadd.xlane.f32.xlu0 %v1529_v27  ;;  %v3388_v27 = vld [vmem:[#allocation11 + $0x50] ss:$8 sps:$4 sm:$0xff]  }
 0x5ec   : > { %1667 = vadd.xlane.f32.xlu0 %v1666_v31  ;;  %v3396_v31 = vld [vmem:[#allocation11 + $0x34] ss:$8 sps:$4 sm:$0xff]  }
 0x620   : > { %v1931_v37 = vpop.xlane.xlu1 %1930 }
 0x621   : > { %v1932_v39 = vsub.f32 %v1923_v61, %v1931_v37  ;;  %v3405_v37 = vld [vmem:[#allocation11 + $0x4] ss:$8 sps:$4 sm:$0xff]  }
 0x623   : > { %v1933_v30 = vpack.c.bf16 %v1932_v39, %v1932_v39  ;;  %v3406_v39 = vld [vmem:[#allocation11 + $0xf0] ss:$8 sps:$4 sm:$0xff]  }
 0x625   : > { %v1935_v48 = vmul.bf16 1069105081, %v1933_v30 }
 0x628   : > { %v2060_v32 = vpop.xlane.xlu0 %2059 }
 0x629   : > { %v2061_v34 = vsub.f32 %v2052_v4, %v2060_v32  ;;  %v1398_v4 = vunpack.c.l.bf16 %v4000_v41  ;;  %v3399_v32 = vld [vmem:[#allocation11 + $0x24] ss:$8 sps:$4 sm:$0xff]  }
 0x62b   : > { %v2062_v2 = vpack.c.bf16 %v2061_v34, %v2061_v34  ;;  %v1399_v8 = vsel %vm1389_vm5, %v1398_v4, 0.0  ;;  %v3397_v34 = vld [vmem:[#allocation11 + $0x20] ss:$8 sps:$4 sm:$0xff]  }
 0x62c   : > { %v3415_v4 = vld [vmem:[#allocation11 + $0xc0] ss:$8 sps:$4 sm:$0xff]  }
 0x62d   : > { %v2064_v29 = vmul.bf16 1069105081, %v2062_v2  ;;  %v3402_v2 = vld [vmem:[#allocation11 + $0x14] ss:$8 sps:$4 sm:$0xff]  }
 0x62f   : > { %3438 = vpow.bf16 %v2064_v29  ;;  %v3400_v29 = vld [vmem:[#allocation11 + $0x10] ss:$8 sps:$4 sm:$0xff]  }
 0x630   : > { %v2196_v38 = vpop.xlane.xlu0 %2195 }
 0x631   : > { %v2197_v35 = vsub.f32 %v2188_v9, %v2196_v38  ;;  %v3403_v38 = vld [vmem:[#allocation11] ss:$8 sps:$4 sm:$0xff]  }
 0x633   : > { %v2198_v40 = vpack.c.bf16 %v2197_v35, %v2197_v35  ;;  %v3408_v35 = vld [vmem:[#allocation11 + $0xf4] ss:$8 sps:$4 sm:$0xff]  }
 0x634   : > { %v1796_v42 = vpop.xlane.xlu0 %1795 }
 0x635   : > { %v2200_v33 = vmul.bf16 1069105081, %v2198_v40  ;;  %v1797_v43 = vsub.f32 %v1788_v56, %v1796_v42  ;;  %v3411_v40 = vld [vmem:[#allocation11 + $0xe4] ss:$8 sps:$4 sm:$0xff]  }
 0x637   : > { %3440 = vpow.bf16 %v2200_v33  ;;  %v1798_v17 = vpack.c.bf16 %v1797_v43, %v1797_v43  ;;  %v3409_v33 = vld [vmem:[#allocation11 + $0xe0] ss:$8 sps:$4 sm:$0xff]  }
 0x638   : > { %v2332_v44 = vpop.xlane.xlu1 %2331  ;;  %v1812_v45 = vpop.permute.xlu0 %1811 }
 0x639   : > { %v1800_v46 = vmul.bf16 1069105081, %v1798_v17  ;;  %v2333_v47 = vsub.f32 %v2324_v13, %v2332_v44  ;;  %3097 = vmatpush3.bf16.msra.mxu0 %v1812_v45 }
 0x63a   : > { %3110 = vmatprep.subr.bf16.mxu0 %v3667_v36 }
 0x63b   : > { %3442 = vpow.bf16 %v1800_v46  ;;  %v2334_v49 = vpack.c.bf16 %v2333_v47, %v2333_v47 }
 0x63c   : > { %3444 = vpow.bf16 %v1935_v48  ;;  %v2076_v10 = vpop.permute.xlu1 %2075  ;;  %v2212_v11 = vpop.permute.xlu0 %2211 }
 0x63d   : > { %v3439_v52 = vpop.eup %3438  ;;  %v2336_v53 = vmul.bf16 1069105081, %v2334_v49 }
 0x63e   : > { %v2066_v55 = vunpack.c.l.bf16 %v3439_v52 }
 0x63f   : > { %3446 = vpow.bf16 %v2336_v53 }
 0x640   : > { %v2067_v56 = vsel %vm1389_vm5, %v2066_v55, 0.0  ;;  %v2348_v12 = vpop.permute.xlu0 %2347 }
 0x641   : > { %2068 = vadd.xlane.f32.xlu1 %v2067_v56 }
 0x645   : > { %v3441_v57 = vpop.eup %3440 }
 0x646   : > { %v2202_v58 = vunpack.c.l.bf16 %v3441_v57 }
 0x648   : > { %v2203_v59 = vsel %vm1389_vm5, %v2202_v58, 0.0 }
 0x649   : > { %v3443_v61 = vpop.eup %3442  ;;  %2204 = vadd.xlane.f32.xlu0 %v2203_v59  ;;  %v3412_v59 = vld [vmem:[#allocation11 + $0xd0] ss:$8 sps:$4 sm:$0xff]  }
 0x64a   : > { %3099 = vmatmul.mubr.msk.bf16.vlgmr.msra.gmra.mxu0 %vm1389_vm5, %v3443_v61  ;;  %v1802_v0 = vunpack.c.l.bf16 %v3443_v61  ;;  %v3445_v1 = vpop.eup %3444  ;;  %v3414_v61 = vld [vmem:[#allocation11 + $0xd4] ss:$8 sps:$4 sm:$0xff]  }
 0x64b   : > { %3111 = vmatpush3.bf16.msra.mxu0 %v3381_v62  ;;  %3112 = vmatprep.mubr.msk.bf16.mxu0 %vm3668_vm2, %v3667_v36  ;;  %v1937_v9 = vunpack.c.l.bf16 %v3445_v1 }
 0x64c   : > { %v1803_v3 = vsel %vm1389_vm5, %v1802_v0, 0.0  ;;  %3124 = vmatprep.subr.bf16.mxu0 %v3667_v36 }
 0x64d   : > { %v3447_v5 = vpop.eup %3446  ;;  %1804 = vadd.xlane.f32.xlu1 %v1803_v3  ;;  %v1938_v41 = vsel %vm1389_vm5, %v1937_v9, 0.0  ;;  %v3418_v9 = vld [vmem:[#allocation11 + $0xb0] ss:$8 sps:$4 sm:$0xff]  }
 0x64e   : > { %v2338_v6 = vunpack.c.l.bf16 %v3447_v5 }
 0x650   : > { %v2339_v7 = vsel %vm1389_vm5, %v2338_v6, 0.0 }
 0x651   : > { %2340 = vadd.xlane.f32.xlu0 %v2339_v7  ;;  %1400 = vadd.xlane.f32.xlu1 %v1399_v8 }
 0x652   : > { %3113 = vmatmul.mubr.msk.bf16.vlgmr.msra.gmra.mxu0 %vm1389_vm5, %v3445_v1 }
 0x653   : > { %3125 = vmatpush3.bf16.msra.mxu0 %v2076_v10  ;;  %3126 = vmatprep.mubr.msk.bf16.mxu0 %vm3668_vm2, %v3667_v36  ;;  %v3420_v10 = vld [vmem:[#allocation11 + $0xb4] ss:$8 sps:$4 sm:$0xff]  }
 0x654   : > { %3138 = vmatprep.subr.bf16.mxu0 %v3667_v36 }
 0x655   : > { %1939 = vadd.xlane.f32.xlu0 %v1938_v41 }
 0x65a   : > { %3127 = vmatmul.mubr.msk.bf16.vlgmr.msra.gmra.mxu0 %vm1389_vm5, %v3439_v52 }
 0x65b   : > { %3139 = vmatpush3.bf16.msra.mxu0 %v2212_v11  ;;  %3140 = vmatprep.mubr.msk.bf16.mxu0 %vm3668_vm2, %v3667_v36  ;;  %v3423_v11 = vld [vmem:[#allocation11 + $0xa4] ss:$8 sps:$4 sm:$0xff]  }
 0x65c   : > { %3152 = vmatprep.subr.bf16.mxu0 %v3667_v36 }
 0x662   : > { %3141 = vmatmul.mubr.msk.bf16.vlgmr.msra.gmra.mxu0 %vm1389_vm5, %v3441_v57 }
 0x663   : > { %3153 = vmatpush3.bf16.msra.mxu0 %v2348_v12  ;;  %3154 = vmatprep.mubr.msk.bf16.mxu0 %vm3668_vm2, %v3667_v36  ;;  %v3384_v36 = vld [vmem:[#allocation11 + $0x74] ss:$8 sps:$4 sm:$0xff]  }
 0x664   : > { %2603 = vmatprep.subr.bf16.mxu1 %v3384_v36  ;;  %v3424_v36 = vld [vmem:[#allocation11 + $0x90] ss:$8 sps:$4 sm:$0xff]  }
 0x665   : > { %2604 = vmatpush1.bf16.msra.mxu1 %v3382_v23 }
 0x666   : > { %2605 = vmatprep.subr.bf16.mxu1 %v3387_v24  ;;  %v3426_v24 = vld [vmem:[#allocation11 + $0x94] ss:$8 sps:$4 sm:$0xff]  }
 0x669   : > { %2606 = vmatpush1.bf16.msra.mxu1 %v3385_v25 }
 0x66a   : > { %3155 = vmatmul.mubr.msk.bf16.vlgmr.msra.gmra.mxu0 %vm1389_vm5, %v3447_v5  ;;  %2607 = vmatprep.subr.bf16.mxu1 %v3390_v26  ;;  %v3417_v5 = vld [vmem:[#allocation11 + $0xc4] ss:$8 sps:$4 sm:$0xff]  }
 0x66b   : > { %v3429_v26 = vld [vmem:[#allocation11 + $0x84] ss:$8 sps:$4 sm:$0xff]  }
 0x66d   : > { %2608 = vmatpush1.bf16.msra.mxu1 %v3388_v27 }
 0x671   : > { %v1531_v16 = vpop.xlane.xlu0 %1530 }
 0x672   : > { %3448 = vrcp.f32 %v1531_v16 }
 0x675   : > { %v1668_v20 = vpop.xlane.xlu0 %1667 }
 0x676   : > { %3450 = vrcp.f32 %v1668_v20 }
 0x67f   : > { %v3449_v13 = vpop.eup %3448 }
 0x680   : > { %v1584_v14 = vmul.f32 %v3449_v13, %v4020_v54  ;;  %v3393_v54 = vld [vmem:[#allocation11 + $0x44] ss:$8 sps:$4 sm:$0xff]  }
 0x681   : > { %2609 = vmatprep.subr.bf16.mxu1 %v3393_v54 }
 0x682   : > { %v2999_v15 = vpack.c.bf16 %v1584_v14, %v1584_v14  ;;  %2610 = vmatpush1.bf16.msra.mxu1 %v3391_v28  ;;  %v3421_v14 = vld [vmem:[#allocation11 + $0xa0] ss:$8 sps:$4 sm:$0xff]  }
 0x683   : > { %v3451_v18 = vpop.eup %3450  ;;  %2611 = vmatprep.subr.bf16.mxu1 %v3396_v31  ;;  %v3427_v28 = vld [vmem:[#allocation11 + $0x80] ss:$8 sps:$4 sm:$0xff]  }
 0x684   : > { %1589 = vrot.lane.b32.xlu1 %v2999_v15, %s3670_s8  ;;  %v1721_v19 = vmul.f32 %v3451_v18, %v4073_v51  ;;  %v3394_v51 = vld [vmem:[#allocation11 + $0x30] ss:$8 sps:$4 sm:$0xff]  }
 0x686   : > { %v3000_v22 = vpack.c.bf16 %v1721_v19, %v1721_v19  ;;  %2612 = vmatpush1.bf16.msra.mxu1 %v3394_v51 }
 0x687   : > { %2613 = vmatprep.subr.bf16.mxu1 %v3399_v32 }
 0x688   : > { %1726 = vrot.lane.b32.xlu1 %v3000_v22, %s3671_s17 }
 0x68a   : > { %2614 = vmatpush1.bf16.msra.mxu1 %v3397_v34 }
 0x68b   : > { %2615 = vmatprep.subr.bf16.mxu1 %v3402_v2 }
 0x68e   : > { %2616 = vmatpush1.bf16.msra.mxu1 %v3400_v29 }
 0x68f   : > { %2617 = vmatprep.subr.bf16.mxu1 %v3405_v37 }
 0x692   : > { %2618 = vmatpush1.bf16.msra.mxu1 %v3403_v38 }
 0x693   : > { %2619 = vmatprep.subr.bf16.mxu1 %v3408_v35 }
 0x696   : > { %2620 = vmatpush2.bf16.msra.mxu1 %v3406_v39 }
 0x697   : > { %2621 = vmatprep.subr.bf16.mxu1 %v3411_v40 }
 0x69a   : > { %2622 = vmatpush2.bf16.msra.mxu1 %v3409_v33 }
 0x69b   : > { %2623 = vmatprep.subr.bf16.mxu1 %v3414_v61 }
 0x69e   : > { %2624 = vmatpush2.bf16.msra.mxu1 %v3412_v59 }
 0x69f   : > { %2625 = vmatprep.subr.bf16.mxu1 %v3417_v5 }
 0x6a2   : > { %2626 = vmatpush2.bf16.msra.mxu1 %v3415_v4 }
 0x6a3   : > { %2627 = vmatprep.subr.bf16.mxu1 %v3420_v10 }
 0x6a6   : > { %2628 = vmatpush2.bf16.msra.mxu1 %v3418_v9 }
 0x6a7   : > { %2629 = vmatprep.subr.bf16.mxu1 %v3423_v11 }
 0x6aa   : > { %2630 = vmatpush2.bf16.msra.mxu1 %v3421_v14 }
 0x6ab   : > { %2631 = vmatprep.subr.bf16.mxu1 %v3426_v24 }
 0x6ae   : > { %2632 = vmatpush2.bf16.msra.mxu1 %v3424_v36 }
 0x6af   : > { %2633 = vmatprep.subr.bf16.mxu1 %v3429_v26 }
 0x6b2   : > { %2634 = vmatpush2.bf16.msra.mxu1 %v3427_v28 }
 0x6ca   : > { %v2069_v42 = vpop.xlane.xlu1 %2068 }
 0x6d2   : > { %v2205_v47 = vpop.xlane.xlu0 %2204 }
 0x6d6   : > { %v1805_v43 = vpop.xlane.xlu1 %1804 }
 0x6da   : > { %v1401_v30 = vpop.xlane.xlu1 %1400  ;;  %v2341_v49 = vpop.xlane.xlu0 %2340 }
 0x6db   : > { %3452 = vrcp.f32 %v1401_v30 }
 0x6de   : > { %v1940_v52 = vpop.xlane.xlu0 %1939 }
 0x6df   : > { %3454 = vrcp.f32 %v1940_v52 }
 0x6e0   : > { %3456 = vrcp.f32 %v2069_v42 }
 0x6e1   : > { %3458 = vrcp.f32 %v1805_v43 }
 0x6e2   : > { %3460 = vrcp.f32 %v2205_v47 }
 0x6e3   : > { %3462 = vrcp.f32 %v2341_v49 }
 0x6e8   : > { %v3453_v17 = vpop.eup %3452 }
 0x6e9   : > { %v1452_v44 = vmul.f32 %v3453_v17, %v4018_v50 }
 0x6eb   : > { %v1453_v45 = vpack.c.bf16 %v1452_v44, %v1452_v44  ;;  %v1156_v44 = vsub.s32 2, %v3910_v60 }
 0x6ec   : > { %v3455_v57 = vpop.eup %3454 }
 0x6ed   : > { %1455 = vst.msk [vmem:[#allocation4] sm:$0xf] %vm1454_vm6, %v1453_v45  ;;  %v3457_v7 = vpop.eup %3456  ;;  %v1160_v45 = vsub.s32 3, %v3910_v60 }
 0x6ee   : > { %v3459_v12 = vpop.eup %3458 }
 0x6ef   : > { %v3461_v22 = vpop.eup %3460 }
 0x6f0   : > { %v3463_v32 = vpop.eup %3462 }
 0x6f6   : > { %v1590_v46 = vpop.permute.xlu1 %1589 }
 0x6f7   : > { %1593 = vst.msk [vmem:[#allocation4] sm:$0xf] %vm1592_vm7, %v1590_v46  ;;  %v3464_v46 = vld [vmem:[%s4191_s3] sm:$0xf] }
 0x6f8   : > { %v1157_v47 = vrot.slane %v3464_v46, %v1156_v44 }
 0x6fa   : > { %v1727_v48 = vpop.permute.xlu1 %1726  ;;  %v1321_v49 = vadd.f32 %v3979_v63, %v1157_v47 }
 0x6fb   : > { %1730 = vst.msk [vmem:[#allocation4] sm:$0xf] %vm1729_vm8, %v1727_v48  ;;  %v1161_v48 = vrot.slane %v3464_v46, %v1160_v45 }
 0x70a   : > { %v1851_v53 = vpop.f32.mrf.mxu0 }
 0x70b   : > { %v1858_v20 = vmul.f32 %v3459_v12, %v1851_v53  ;;  %v1323_v53 = vadd.f32 %v3981_v21, %v1161_v48 }
 0x70c   : > { %v3100_v55 = vpop.f32.mrf.mxu0 }
 0x70d   : > { %v3001_v19 = vpack.c.bf16 %v1858_v20, %v1858_v20 }
 0x70e   : > { %v1854_v50 = vpop.f32.mrf.mxu0 }
 0x710   : > { %v3101_v56 = vpop.f32.mrf.mxu0 }
 0x712   : > { %v1984_v58 = vpop.f32.mrf.mxu0 }
 0x713   : > { %v1991_v62 = vmul.f32 %v3455_v57, %v1984_v58 }
 0x714   : > { %v3114_v0 = vpop.f32.mrf.mxu0 }
 0x715   : > { %v1992_v1 = vpack.c.bf16 %v1991_v62, %v1991_v62 }
 0x716   : > { %v1987_v3 = vpop.f32.mrf.mxu0 }
 0x717   : > { %1993 = vst.msk [vmem:[#allocation4 + $0x4] sm:$0xf] %vm1454_vm6, %v1992_v1 }
 0x718   : > { %v3115_v6 = vpop.f32.mrf.mxu0 }
 0x71a   : > { %v2115_v8 = vpop.f32.mrf.mxu0 }
 0x71b   : > { %v2122_v41 = vmul.f32 %v3457_v7, %v2115_v8 }
 0x71c   : > { %v3128_v16 = vpop.f32.mrf.mxu0 }
 0x71d   : > { %v3002_v13 = vpack.c.bf16 %v2122_v41, %v2122_v41 }
 0x71e   : > { %v2118_v15 = vpop.f32.mrf.mxu0 }
 0x71f   : > { %2127 = vrot.lane.b32.xlu0 %v3002_v13, %s3670_s8 }
 0x720   : > { %v3129_v18 = vpop.f32.mrf.mxu0 }
 0x722   : > { %v2251_v23 = vpop.f32.mrf.mxu0 }
 0x723   : > { %v2258_v25 = vmul.f32 %v3461_v22, %v2251_v23  ;;  %1863 = vrot.lane.b32.xlu0 %v3001_v19, %s3669_s22 }
 0x724   : > { %v3142_v27 = vpop.f32.mrf.mxu0 }
 0x725   : > { %v3003_v54 = vpack.c.bf16 %v2258_v25, %v2258_v25 }
 0x726   : > { %v2254_v31 = vpop.f32.mrf.mxu0 }
 0x727   : > { %2263 = vrot.lane.b32.xlu1 %v3003_v54, %s3671_s17 }
 0x728   : > { %v3143_v51 = vpop.f32.mrf.mxu0 }
 0x72a   : > { %v2387_v34 = vpop.f32.mrf.mxu0 }
 0x72b   : > { %v2394_v2 = vmul.f32 %v3463_v32, %v2387_v34 }
 0x72c   : > { %v3156_v29 = vpop.f32.mrf.mxu0 }
 0x72d   : > { %v3004_v37 = vpack.c.bf16 %v2394_v2, %v2394_v2 }
 0x72e   : > { %v2390_v38 = vpop.f32.mrf.mxu0 }
 0x72f   : > { %2399 = vrot.lane.b32.xlu1 %v3004_v37, %s3669_s22  ;;  %s3575_s22 = sshll.u32 %s3672_s23, 4  ;;  %s3576_s22 = int_to_ptr.vmem [resolvable:$false] %s3575_s22 }
 0x730   : > { %v3157_v35 = vpop.f32.mrf.mxu0  ;;  %s3577_s4 = scalar_lea.vmem %s3576_s22, 512  ;;  %p3578_p3 = scmp.lt.s32.totalorder %s4142_s26, %s3576_s22 }
 0x731   : > { %p3579_p2 = scmp.lt.s32.totalorder %s3577_s4, %s3571_s24 }
 0x733   : > { %p3580_p11 = por %p3579_p2, %p3578_p3 }
 0x735   : > { %p3581_p10 = pnand %p3580_p11, %p3574_p0 }
 0x791   : > { %v2128_v39 = vpop.permute.xlu0 %2127 }
 0x792   : > { %2130 = vst.msk [vmem:[#allocation4 + $0x4] sm:$0xf] %vm1592_vm7, %v2128_v39 }
 0x795   : > { %v1864_v40 = vpop.permute.xlu0 %1863 }
 0x796   : > { %1867 = vst.msk [vmem:[#allocation4] sm:$0xf] %vm1866_vm9, %v1864_v40 }
 0x799   : > { %v2264_v42 = vpop.permute.xlu1 %2263 }
 0x79a   : > { %2266 = vst.msk [vmem:[#allocation4 + $0x4] sm:$0xf] %vm1729_vm8, %v2264_v42 }
 0x7a1   : > { %v2400_v33 = vpop.permute.xlu1 %2399 }
 0x7a2   : > { %2402 = vst.msk [vmem:[#allocation4 + $0x4] sm:$0xf] %vm1866_vm9, %v2400_v33 }
 0x7a9   : > { %v2403_v43 = vld [vmem:[#allocation4] sm:$0xff] }
 0x7aa   : > { %v2957_v30 = vcombine.low %v2403_v43, %v2403_v43  ;;  %v2958_v17 = vcombine.high %v2403_v43, %v2403_v43 }
 0x7ac   : > { %2635 = vmatprep.mubr.bf16.mxu1 %v2958_v17 }
 0x7ad   : > { %2636 = vmatmul.mubr.bf16.vlgmr.msra.gmra.mxu1 %v2957_v30 }
 0x86d   : > { %v2637_v52 = vpop.f32.mrf.mxu1 }
 0x86e   : > { %v2638_v55 = vadd.f32 %v2637_v52, %v1321_v49 }
 0x86f   : > { %v2639_v50 = vpop.f32.mrf.mxu1 }
 0x870   : > { %2644 = vst [vmem:[%s429_s29] sm:$0xff] %v2638_v55  ;;  %v2640_v60 = vadd.f32 %v2639_v50, %v1323_v53 }
 0x871   : > { %v2641_v63 = vpop.f32.mrf.mxu1 }
 0x872   : > { %2645 = vst [vmem:[%s429_s29 + $0x8] sm:$0xff] %v2640_v60 }
 0x873   : > { %v2642_v56 = vpop.f32.mrf.mxu1 }
 0x874   : > { %3584 = shalt.err (!%p3581_p10)
}
 0x875   : > { %s3585_s6 = scalar_lea.hbm %s4140_s28, 256  ;;  %s3589_s17 = scalar_lea.hbm %s4197_s9, 512 }
 0x876   : > { %p3586_p7 = scmp.ne.s32.totalorder %s4140_s28, %s3585_s6  ;;  %p3590_p9 = scmp.lt.s32.totalorder %s4140_s28, %s4197_s9 }
 0x877   : > { %p3591_p5 = scmp.lt.s32.totalorder %s3589_s17, %s3585_s6 }
 0x878   : > { %p3587_p6 = pnand %p3586_p7, %p4221_p8 }
 0x879   : > { %p3592_p1 = por %p3591_p5, %p3590_p9 }
 0x87a   : > { %p3588_p12 = pneg %p3587_p6 }
 0x87c   : > { %p3593_p4 = pnand %p3592_p1, %p3588_p12 }
 0x87e   : > { %3596 = shalt.err (!%p3593_p4)
}
 0x87f   : > { %3172 = dma.vmem_to_hbm [thread:$0]  (%p4221_p8), %s4142_s26, 256, %s4140_s28, %s2647_s12  }
 0x880 PF: > { %s4222_s18 = sld [smem:[#allocation18_spill]]  ;;  %s2675_s29 = sand.u32 1, %s3639_s30  }
 0x881   : > { %p4224_p0 = scmp.ge.s32.totalorder %s3659_s14, 2  ;;  %s2676_s15 = scalar_lea.sflag [#allocation7], %s2675_s29 }
 0x886   : > { %p4223_p13 = scmp.ne.s32.totalorder %s4222_s18, 0 }
 0x888   : > { %p3189_p3 = pnand %p4224_p0, %p4223_p13 }
 0x88a   : > { %p3190_p2 = pneg %p3189_p3 }
 0x88c   : > { %3634 = dma.done.wait (%p3190_p2), %s2676_s15, 256  }
 0x88d   : > { %3636 = vsyncadd (%p3190_p2), %s2676_s15, 4294967040  ;;  %s27_s14 = sadd.s32 1, %s3659_s14   ;;  %s4225_s25 = sld [smem:[#allocation19_spill]] }
 0x88e   : > { %p24_p11 = scmp.ge.s32.totalorder %s27_s14, 4   ;;  %s4226_s30 = smov %s3643_s10 }
 0x88f   : > { %s4227_s10 = smov %s3647_s11  ;;  %s4228_s11 = smov %s3844_s20 }
 0x890   : > { %s4229_s12 = smov %s3655_s13  ;;  %26 = sbr.rel (!%p24_p11) target bundleno = 12 (0xc), region = 120 }
 0x893   : > { %s4230_s13 = smov %s4225_s25 }
 0x895   :  { %2681 = vsyncpa [#allocation6], 1 }
 0x896   :  { %2683 = vsyncpa [#allocation6 + $0x1], 1 }
 0x897   :  { %2684 = vsyncpa [#allocation9], 1 }
 0x898   :  { %2685 = vsyncpa [#allocation12], 1 }
 0x899   :  { %2686 = vsyncpa [#allocation7], 1 }
 0x89a   :  { %2688 = vsyncpa [#allocation7 + $0x1], 1 }

</bundles_post_ra>
